<compile_context>
chip_gen: v5e
topology: v5e:2x2
jax: 0.10.0
libtpu: 0.0.40
codegen_flags: <defaults>
</compile_context>

<pallas_src>
import functools

import numpy as np

import jax
import jax.numpy as jnp
from jax.experimental import pallas as pl
from jax.experimental.pallas import tpu as pltpu


# -----------------------------------------------------------------------------
# Fused kernel: conv1+BN+ReLU -> conv2+BN+ReLU -> GRU -> Linear+tanh
# -----------------------------------------------------------------------------
def ref_encoder_kernel(p1_ref, p1g_ref, mask_ref,
                       w1_ref, b1_ref, g1_ref, be1_ref, t1_ref,
                       w1blk_ref, w2blk_ref, b2_ref, g2_ref, be2_ref,
                       t2_ref, t2t_ref,
                       wix_ref, bx_ref, wh_ref, bhn_ref,
                       wlin_ref, blin_ref, o_ref,
                       *, n_batch, nb, seq_len, wo2):
    eps = 1e-5
    f32 = jnp.float32
    hidden = wh_ref.shape[0]

    # --- conv1 on the unique N*Ho1*Wo1 positions -> BN1 batch stats (training) ---
    a1 = jnp.dot(p1_ref[...], w1_ref[...], preferred_element_type=f32) + b1_ref[...]
    inv_m1 = 1.0 / a1.shape[0]
    mean1 = jnp.sum(a1, axis=0, keepdims=True) * inv_m1
    var1 = jnp.maximum(
        jnp.sum(a1 * a1, axis=0, keepdims=True) * inv_m1 - mean1 * mean1, 0.0)
    scale1 = g1_ref[...] * jax.lax.rsqrt(var1 + eps)
    shift1 = be1_ref[...] - mean1 * scale1
    # Broadcast per-channel (C1) quantities across the (w, tap) lane groups via
    # a constant 0/1 tiling matrix (no in-kernel reshape/tile relayouts).
    scale1_t = jnp.dot(scale1, t1_ref[...], preferred_element_type=f32)
    shift1_t = jnp.dot(shift1, t1_ref[...], preferred_element_type=f32)
    b1_t = jnp.dot(b1_ref[...], t1_ref[...], preferred_element_type=f32)

    # --- conv2 as TWO fat matmuls (block-diagonal weights, lanes = (w, tap, c1)) ---
    a1g = jnp.dot(p1g_ref[...], w1blk_ref[...], preferred_element_type=f32) + b1_t
    y1g = jnp.maximum(a1g * scale1_t + shift1_t, 0.0)        # (L*NB, wo2*taps*C1)
    b2_t = jnp.dot(b2_ref[...], t2_ref[...], preferred_element_type=f32)
    a2 = jnp.dot(y1g, w2blk_ref[...], preferred_element_type=f32) + b2_t  # (L*NB, wo2*C2)

    # --- BN2 stats per C2 channel (padded batch rows masked out) ---
    mask = mask_ref[...]                                      # (L*NB, 1), 1.0 on real rows
    inv_m2 = 1.0 / float(n_batch * seq_len * wo2)
    a2m = a2 * mask
    colsum = jnp.sum(a2m, axis=0, keepdims=True)              # (1, wo2*C2)
    colsq = jnp.sum(a2m * a2, axis=0, keepdims=True)
    sum_c = jnp.dot(colsum, t2t_ref[...], preferred_element_type=f32)   # (1, C2)
    sumsq_c = jnp.dot(colsq, t2t_ref[...], preferred_element_type=f32)
    mean2 = sum_c * inv_m2
    var2 = jnp.maximum(sumsq_c * inv_m2 - mean2 * mean2, 0.0)
    scale2 = g2_ref[...] * jax.lax.rsqrt(var2 + eps)
    shift2 = be2_ref[...] - mean2 * scale2
    scale2_t = jnp.dot(scale2, t2_ref[...], preferred_element_type=f32)
    shift2_t = jnp.dot(shift2, t2_ref[...], preferred_element_type=f32)
    y2 = jnp.maximum(a2 * scale2_t + shift2_t, 0.0)           # (L*NB, wo2*C2)

    # --- GRU input projection hoisted over all timesteps: ONE dot ---
    gx = jnp.dot(y2, wix_ref[...], preferred_element_type=f32) + bx_ref[...]  # (L*NB, 3H)

    # --- GRU recurrence (L tiny & static -> unrolled); slices are 8-row aligned ---
    wh = wh_ref[...]
    bhn = bhn_ref[...]
    h = jnp.zeros((nb, hidden), f32)
    for t in range(seq_len):
        gx_t = gx[t * nb:(t + 1) * nb, :]                     # tile-aligned (NB rows)
        gh = jnp.dot(h, wh, preferred_element_type=f32)       # (NB, 3H)
        r = jax.nn.sigmoid(gx_t[:, :hidden] + gh[:, :hidden])
        z = jax.nn.sigmoid(gx_t[:, hidden:2 * hidden] + gh[:, hidden:2 * hidden])
        c = jnp.tanh(gx_t[:, 2 * hidden:] + r * (gh[:, 2 * hidden:] + bhn))
        h = (1.0 - z) * c + z * h

    out = jnp.tanh(jnp.dot(h, wlin_ref[...], preferred_element_type=f32) + blin_ref[...])
    o_ref[...] = out[:n_batch, :]


# -----------------------------------------------------------------------------
# Host-side (tiny, one-time) data / weight packing
# -----------------------------------------------------------------------------
def _im2col_input(x2d, k, s):
    """x2d: (N, H, W) single-channel -> patches (N*Ho*Wo, k*k), Ho, Wo.
    Column order (kh, kw) matches the flattened PyTorch conv weight."""
    n, h, w = x2d.shape
    ho = (h - k) // s + 1
    wo = (w - k) // s + 1
    cols = []
    for i in range(k):
        for j in range(k):
            cols.append(x2d[:, i:i + s * ho:s, j:j + s * wo:s])   # (N, Ho, Wo)
    p = jnp.stack(cols, axis=-1)                                  # (N, Ho, Wo, k*k)
    return p.reshape(n * ho * wo, k * k), ho, wo


def _layer2_gather_indices_packed(n, nb, ho1, wo1, ho2, wo2, k, s):
    """Row indices into the layer-1 im2col so p1[idx] already has the layout
    rows=(t, b_padded) and lane groups=(w, tap) that the fused conv2 matmuls
    consume.  Padded batch rows (b >= n) point at sample 0; they are masked
    out of the BN2 statistics and dropped after the GRU."""
    idx = np.zeros((ho2 * nb, wo2 * k * k), dtype=np.int32)
    for t in range(ho2):
        for b in range(nb):
            bb = b if b < n else 0
            r = t * nb + b
            for w in range(wo2):
                for i2 in range(k):
                    for j2 in range(k):
                        g = (w * k + i2) * k + j2               # (w, tap) group
                        idx[r, g] = bb * ho1 * wo1 + (i2 + s * t) * wo1 + (j2 + s * w)
    return idx


def reference_encoder_forward(x, params, *, filter_size, filter_stride):
    """x: (N, 1, L_R, d_R) float32 (NCHW, same as the PyTorch module)."""
    assert len(params["conv"]) == 2, "fused kernel is specialized to 2 conv layers"
    k, s = filter_size, filter_stride
    kk = k * k
    n = x.shape[0]
    l1, l2 = params["conv"]
    c1 = l1["w"].shape[0]
    c2 = l2["w"].shape[0]

    # Layer-1 im2col of the raw input (unique conv1 positions, used for BN1 stats).
    p1, ho1, wo1 = _im2col_input(x[:, 0], k, s)               # (N*Ho1*Wo1, kk)
    ho2 = (ho1 - k) // s + 1
    wo2 = (wo1 - k) // s + 1
    taps = kk
    nb = ((n + 7) // 8) * 8                                    # batch padded per timestep

    # Layer-2 im2col packed with (w, tap) in the lane dim, rows = (t, b_padded).
    # TODO(synk): at production sizes do this gather inside the kernel
    # (scalar-prefetch indices / DMA gather) instead of materializing it.
    idx = _layer2_gather_indices_packed(n, nb, ho1, wo1, ho2, wo2, k, s)
    p1g = p1[jnp.asarray(idx)].reshape(ho2 * nb, wo2 * taps * kk)

    mask_np = np.zeros((ho2 * nb, 1), np.float32)
    for t in range(ho2):
        mask_np[t * nb:t * nb + n, 0] = 1.0
    mask = jnp.asarray(mask_np)

    # --- weight packing (pure layout plumbing, done once) ---
    bf16 = jnp.bfloat16
    w1_2d = l1["w"].transpose(2, 3, 1, 0).reshape(kk, c1)                  # (kk, C1)
    w2_2d = l2["w"].transpose(2, 3, 1, 0).reshape(kk * c1, c2)             # (taps*C1, C2)
    w1blk = jnp.kron(jnp.eye(wo2 * taps, dtype=jnp.float32), w1_2d)        # (wo2*taps*kk, wo2*taps*C1)
    w2blk = jnp.kron(jnp.eye(wo2, dtype=jnp.float32), w2_2d)               # (wo2*taps*C1, wo2*C2)
    t1 = jnp.tile(jnp.eye(c1, dtype=jnp.float32), (1, wo2 * taps))         # (C1, wo2*taps*C1)
    t2 = jnp.tile(jnp.eye(c2, dtype=jnp.float32), (1, wo2))                # (C2, wo2*C2)

    gru = params["gru"]
    hdim = gru["whr"].shape[0]
    wi = jnp.concatenate([gru["wir"], gru["wiz"], gru["win"]], axis=1)     # (C2*Wo2, 3H)
    # GRU feature order is (c2, w); the conv2 output lanes are (w, c2) -> reorder rows.
    wix = wi.reshape(c2, wo2, 3 * hdim).transpose(1, 0, 2).reshape(wo2 * c2, 3 * hdim)
    bias_x = jnp.concatenate([gru["bir"] + gru["bhr"],
                              gru["biz"] + gru["bhz"],
                              gru["bin"]], axis=1)                          # (1, 3H)
    wh = jnp.concatenate([gru["whr"], gru["whz"], gru["whn"]], axis=1)      # (H, 3H)

    lin = params["linear"]
    e_dim = lin["w"].shape[1]

    args = (
        p1.astype(bf16), p1g.astype(bf16), mask,
        w1_2d.astype(bf16),
        l1["b"].reshape(1, c1), l1["gamma"].reshape(1, c1), l1["beta"].reshape(1, c1),
        t1.astype(bf16),
        w1blk.astype(bf16), w2blk.astype(bf16),
        l2["b"].reshape(1, c2), l2["gamma"].reshape(1, c2), l2["beta"].reshape(1, c2),
        t2.astype(bf16), t2.T.astype(bf16),
        wix.astype(bf16), bias_x, wh.astype(bf16), gru["bhn"],
        lin["w"].astype(bf16), lin["b"],
    )
    vmem = pl.BlockSpec(memory_space=pltpu.MemorySpace.VMEM)
    kernel = functools.partial(ref_encoder_kernel,
                               n_batch=n, nb=nb, seq_len=ho2, wo2=wo2)
    return pl.pallas_call(
        kernel,
        out_shape=jax.ShapeDtypeStruct((n, e_dim), jnp.float32),
        in_specs=[vmem] * len(args),
        out_specs=vmem,
    )(*args)


# -----------------------------------------------------------------------------
# Deterministic parameter construction
# -----------------------------------------------------------------------------
def make_params(key, filter_size, filter_channels, rnn_input_dim, embedding_dim):
    params = {"conv": []}
    in_ch = 1
    for cout in filter_channels:
        key, k1, k2, k3, k4 = jax.random.split(key, 5)
        params["conv"].append({
            "w": 0.3 * jax.random.normal(k1, (cout, in_ch, filter_size, filter_size), jnp.float32),
            "b": 0.1 * jax.random.normal(k2, (cout,), jnp.float32),
            "gamma": 1.0 + 0.1 * jax.random.normal(k3, (cout,), jnp.float32),
            "beta": 0.1 * jax.random.normal(k4, (cout,), jnp.float32),
        })
        in_ch = cout

    H = embedding_dim
    Din = rnn_input_dim
    gru = {}
    for name, shape in [("wir", (Din, H)), ("wiz", (Din, H)), ("win", (Din, H)),
                        ("whr", (H, H)), ("whz", (H, H)), ("whn", (H, H))]:
        key, k = jax.random.split(key)
        gru[name] = 0.2 * jax.random.normal(k, shape, jnp.float32)
    for name in ["bir", "biz", "bin", "bhr", "bhz", "bhn"]:
        key, k = jax.random.split(key)
        gru[name] = 0.1 * jax.random.normal(k, (1, H), jnp.float32)
    params["gru"] = gru

    key, k1, k2 = jax.random.split(key, 3)
    params["linear"] = {
        "w": 0.2 * jax.random.normal(k1, (H, embedding_dim), jnp.float32),
        "b": 0.1 * jax.random.normal(k2, (1, embedding_dim), jnp.float32),
    }
    return params


if __name__ == "__main__":
    # Small hparams consistent with the module:
    #   input_dims=(16,16), filter_size=3, filter_stride=2,
    #   filter_channels=[4, 8], embedding_dim=32, activation=tanh.
    batch = 2
    input_dims = (16, 16)
    filter_size = 3
    filter_stride = 2
    filter_channels = [4, 8]
    embedding_dim = 32

    # conv output dims: 16 -> 7 -> 3  =>  rnn_input_dim = 8 * 3 = 24
    h = input_dims[0]
    w = input_dims[1]
    for _ in filter_channels:
        h = (h - filter_size) // filter_stride + 1
        w = (w - filter_size) // filter_stride + 1
    rnn_input_dim = filter_channels[-1] * w

    key = jax.random.PRNGKey(0)
    key, kx = jax.random.split(key)
    x = jax.random.normal(kx, (batch, 1, *input_dims), jnp.float32)

    params = make_params(key, filter_size, filter_channels, rnn_input_dim, embedding_dim)

    fwd = jax.jit(functools.partial(reference_encoder_forward,
                                    filter_size=filter_size,
                                    filter_stride=filter_stride))
    out = fwd(x, params)
    out = jax.block_until_ready(out)
    assert out.shape == (batch, embedding_dim), out.shape
    assert bool(jnp.all(jnp.isfinite(out))), "non-finite output"
    print("KERNEL_OK")
</pallas_src>

<mosaic_0001>
module attributes {stable_mosaic.version = 11 : i64} {
  func.func @ref_encoder_kernel(%arg0: memref<98x9xbf16, #tpu.memory_space<vmem>>, %arg1: memref<24x243xbf16, #tpu.memory_space<vmem>>, %arg2: memref<24x1xf32, #tpu.memory_space<vmem>>, %arg3: memref<9x4xbf16, #tpu.memory_space<vmem>>, %arg4: memref<1x4xf32, #tpu.memory_space<vmem>>, %arg5: memref<1x4xf32, #tpu.memory_space<vmem>>, %arg6: memref<1x4xf32, #tpu.memory_space<vmem>>, %arg7: memref<4x108xbf16, #tpu.memory_space<vmem>>, %arg8: memref<243x108xbf16, #tpu.memory_space<vmem>>, %arg9: memref<108x24xbf16, #tpu.memory_space<vmem>>, %arg10: memref<1x8xf32, #tpu.memory_space<vmem>>, %arg11: memref<1x8xf32, #tpu.memory_space<vmem>>, %arg12: memref<1x8xf32, #tpu.memory_space<vmem>>, %arg13: memref<8x24xbf16, #tpu.memory_space<vmem>>, %arg14: memref<24x8xbf16, #tpu.memory_space<vmem>>, %arg15: memref<24x96xbf16, #tpu.memory_space<vmem>>, %arg16: memref<1x96xf32, #tpu.memory_space<vmem>>, %arg17: memref<32x96xbf16, #tpu.memory_space<vmem>>, %arg18: memref<1x32xf32, #tpu.memory_space<vmem>>, %arg19: memref<32x32xbf16, #tpu.memory_space<vmem>>, %arg20: memref<1x32xf32, #tpu.memory_space<vmem>>, %arg21: memref<2x32xf32, #tpu.memory_space<vmem>>) attributes {dimension_semantics = [], scalar_prefetch = 0 : i64, scratch_operands = 0 : i64, tpu.core_type = #tpu.core_type<tc>} {
    %c0 = arith.constant 0 : index
    %c0_0 = arith.constant 0 : index
    %0 = vector.load %arg0[%c0, %c0_0] : memref<98x9xbf16, #tpu.memory_space<vmem>>, vector<98x9xbf16>
    %c0_1 = arith.constant 0 : index
    %c0_2 = arith.constant 0 : index
    %1 = vector.load %arg3[%c0_1, %c0_2] : memref<9x4xbf16, #tpu.memory_space<vmem>>, vector<9x4xbf16>
    %cst = arith.constant dense<0.000000e+00> : vector<98x4xf32>
    %2 = tpu.matmul %0, %1, %cst {dimension_numbers = #tpu.dot_dimension_numbers<[1], [0], [0], [1], [0, 0, 1, 1], [], []>} : vector<98x9xbf16>, vector<9x4xbf16>, vector<98x4xf32> -> vector<98x4xf32>
    %c0_3 = arith.constant 0 : index
    %c0_4 = arith.constant 0 : index
    %3 = vector.load %arg4[%c0_3, %c0_4] : memref<1x4xf32, #tpu.memory_space<vmem>>, vector<1x4xf32>
    %4 = vector.broadcast %3 : vector<1x4xf32> to vector<98x4xf32>
    %5 = arith.addf %2, %4 : vector<98x4xf32>
    %cst_5 = arith.constant dense<0.000000e+00> : vector<4xf32>
    %6 = vector.multi_reduction <add>, %5, %cst_5 [0] : vector<98x4xf32> to vector<4xf32>
    %7 = vector.shape_cast %6 : vector<4xf32> to vector<1x4xf32>
    %cst_6 = arith.constant 0.0102040814 : f32
    %8 = vector.broadcast %cst_6 : f32 to vector<1x4xf32>
    %9 = arith.mulf %7, %8 : vector<1x4xf32>
    %10 = arith.mulf %5, %5 : vector<98x4xf32>
    %cst_7 = arith.constant dense<0.000000e+00> : vector<4xf32>
    %11 = vector.multi_reduction <add>, %10, %cst_7 [0] : vector<98x4xf32> to vector<4xf32>
    %12 = vector.shape_cast %11 : vector<4xf32> to vector<1x4xf32>
    %cst_8 = arith.constant 0.0102040814 : f32
    %13 = vector.broadcast %cst_8 : f32 to vector<1x4xf32>
    %14 = arith.mulf %12, %13 : vector<1x4xf32>
    %15 = arith.mulf %9, %9 : vector<1x4xf32>
    %16 = arith.subf %14, %15 : vector<1x4xf32>
    %cst_9 = arith.constant 0.000000e+00 : f32
    %17 = vector.broadcast %cst_9 : f32 to vector<1x4xf32>
    %18 = arith.maximumf %16, %17 : vector<1x4xf32>
    %c0_10 = arith.constant 0 : index
    %c0_11 = arith.constant 0 : index
    %19 = vector.load %arg5[%c0_10, %c0_11] : memref<1x4xf32, #tpu.memory_space<vmem>>, vector<1x4xf32>
    %cst_12 = arith.constant 9.99999974E-6 : f32
    %20 = vector.broadcast %cst_12 : f32 to vector<1x4xf32>
    %21 = arith.addf %18, %20 : vector<1x4xf32>
    %22 = math.rsqrt %21 : vector<1x4xf32>
    %23 = arith.mulf %19, %22 : vector<1x4xf32>
    %c0_13 = arith.constant 0 : index
    %c0_14 = arith.constant 0 : index
    %24 = vector.load %arg6[%c0_13, %c0_14] : memref<1x4xf32, #tpu.memory_space<vmem>>, vector<1x4xf32>
    %25 = arith.mulf %9, %23 : vector<1x4xf32>
    %26 = arith.subf %24, %25 : vector<1x4xf32>
    %c0_15 = arith.constant 0 : index
    %c0_16 = arith.constant 0 : index
    %27 = vector.load %arg7[%c0_15, %c0_16] : memref<4x108xbf16, #tpu.memory_space<vmem>>, vector<4x108xbf16>
    %cst_17 = arith.constant dense<0.000000e+00> : vector<1x108xf32>
    %28 = tpu.matmul %23, %27, %cst_17 {dimension_numbers = #tpu.dot_dimension_numbers<[1], [0], [0], [1], [0, 0, 1, 1], [], []>} : vector<1x4xf32>, vector<4x108xbf16>, vector<1x108xf32> -> vector<1x108xf32>
    %c0_18 = arith.constant 0 : index
    %c0_19 = arith.constant 0 : index
    %29 = vector.load %arg7[%c0_18, %c0_19] : memref<4x108xbf16, #tpu.memory_space<vmem>>, vector<4x108xbf16>
    %cst_20 = arith.constant dense<0.000000e+00> : vector<1x108xf32>
    %30 = tpu.matmul %26, %29, %cst_20 {dimension_numbers = #tpu.dot_dimension_numbers<[1], [0], [0], [1], [0, 0, 1, 1], [], []>} : vector<1x4xf32>, vector<4x108xbf16>, vector<1x108xf32> -> vector<1x108xf32>
    %c0_21 = arith.constant 0 : index
    %c0_22 = arith.constant 0 : index
    %31 = vector.load %arg4[%c0_21, %c0_22] : memref<1x4xf32, #tpu.memory_space<vmem>>, vector<1x4xf32>
    %c0_23 = arith.constant 0 : index
    %c0_24 = arith.constant 0 : index
    %32 = vector.load %arg7[%c0_23, %c0_24] : memref<4x108xbf16, #tpu.memory_space<vmem>>, vector<4x108xbf16>
    %cst_25 = arith.constant dense<0.000000e+00> : vector<1x108xf32>
    %33 = tpu.matmul %31, %32, %cst_25 {dimension_numbers = #tpu.dot_dimension_numbers<[1], [0], [0], [1], [0, 0, 1, 1], [], []>} : vector<1x4xf32>, vector<4x108xbf16>, vector<1x108xf32> -> vector<1x108xf32>
    %c0_26 = arith.constant 0 : index
    %c0_27 = arith.constant 0 : index
    %34 = vector.load %arg1[%c0_26, %c0_27] : memref<24x243xbf16, #tpu.memory_space<vmem>>, vector<24x243xbf16>
    %c0_28 = arith.constant 0 : index
    %c0_29 = arith.constant 0 : index
    %35 = vector.load %arg8[%c0_28, %c0_29] : memref<243x108xbf16, #tpu.memory_space<vmem>>, vector<243x108xbf16>
    %cst_30 = arith.constant dense<0.000000e+00> : vector<24x108xf32>
    %36 = tpu.matmul %34, %35, %cst_30 {dimension_numbers = #tpu.dot_dimension_numbers<[1], [0], [0], [1], [0, 0, 1, 1], [], []>} : vector<24x243xbf16>, vector<243x108xbf16>, vector<24x108xf32> -> vector<24x108xf32>
    %37 = vector.broadcast %33 : vector<1x108xf32> to vector<24x108xf32>
    %38 = arith.addf %36, %37 : vector<24x108xf32>
    %39 = vector.broadcast %28 : vector<1x108xf32> to vector<24x108xf32>
    %40 = arith.mulf %38, %39 : vector<24x108xf32>
    %41 = vector.broadcast %30 : vector<1x108xf32> to vector<24x108xf32>
    %42 = arith.addf %40, %41 : vector<24x108xf32>
    %cst_31 = arith.constant 0.000000e+00 : f32
    %43 = vector.broadcast %cst_31 : f32 to vector<24x108xf32>
    %44 = arith.maximumf %42, %43 : vector<24x108xf32>
    %c0_32 = arith.constant 0 : index
    %c0_33 = arith.constant 0 : index
    %45 = vector.load %arg10[%c0_32, %c0_33] : memref<1x8xf32, #tpu.memory_space<vmem>>, vector<1x8xf32>
    %c0_34 = arith.constant 0 : index
    %c0_35 = arith.constant 0 : index
    %46 = vector.load %arg13[%c0_34, %c0_35] : memref<8x24xbf16, #tpu.memory_space<vmem>>, vector<8x24xbf16>
    %cst_36 = arith.constant dense<0.000000e+00> : vector<1x24xf32>
    %47 = tpu.matmul %45, %46, %cst_36 {dimension_numbers = #tpu.dot_dimension_numbers<[1], [0], [0], [1], [0, 0, 1, 1], [], []>} : vector<1x8xf32>, vector<8x24xbf16>, vector<1x24xf32> -> vector<1x24xf32>
    %c0_37 = arith.constant 0 : index
    %c0_38 = arith.constant 0 : index
    %48 = vector.load %arg9[%c0_37, %c0_38] : memref<108x24xbf16, #tpu.memory_space<vmem>>, vector<108x24xbf16>
    %cst_39 = arith.constant dense<0.000000e+00> : vector<24x24xf32>
    %49 = tpu.matmul %44, %48, %cst_39 {dimension_numbers = #tpu.dot_dimension_numbers<[1], [0], [0], [1], [0, 0, 1, 1], [], []>} : vector<24x108xf32>, vector<108x24xbf16>, vector<24x24xf32> -> vector<24x24xf32>
    %50 = vector.broadcast %47 : vector<1x24xf32> to vector<24x24xf32>
    %51 = arith.addf %49, %50 : vector<24x24xf32>
    %c0_40 = arith.constant 0 : index
    %c0_41 = arith.constant 0 : index
    %52 = vector.load %arg2[%c0_40, %c0_41] : memref<24x1xf32, #tpu.memory_space<vmem>>, vector<24x1xf32>
    %53 = vector.broadcast %52 : vector<24x1xf32> to vector<24x24xf32>
    %54 = arith.mulf %51, %53 : vector<24x24xf32>
    %cst_42 = arith.constant dense<0.000000e+00> : vector<24xf32>
    %55 = vector.multi_reduction <add>, %54, %cst_42 [0] : vector<24x24xf32> to vector<24xf32>
    %56 = vector.shape_cast %55 : vector<24xf32> to vector<1x24xf32>
    %57 = arith.mulf %54, %51 : vector<24x24xf32>
    %cst_43 = arith.constant dense<0.000000e+00> : vector<24xf32>
    %58 = vector.multi_reduction <add>, %57, %cst_43 [0] : vector<24x24xf32> to vector<24xf32>
    %59 = vector.shape_cast %58 : vector<24xf32> to vector<1x24xf32>
    %c0_44 = arith.constant 0 : index
    %c0_45 = arith.constant 0 : index
    %60 = vector.load %arg14[%c0_44, %c0_45] : memref<24x8xbf16, #tpu.memory_space<vmem>>, vector<24x8xbf16>
    %cst_46 = arith.constant dense<0.000000e+00> : vector<1x8xf32>
    %61 = tpu.matmul %56, %60, %cst_46 {dimension_numbers = #tpu.dot_dimension_numbers<[1], [0], [0], [1], [0, 0, 1, 1], [], []>} : vector<1x24xf32>, vector<24x8xbf16>, vector<1x8xf32> -> vector<1x8xf32>
    %c0_47 = arith.constant 0 : index
    %c0_48 = arith.constant 0 : index
    %62 = vector.load %arg14[%c0_47, %c0_48] : memref<24x8xbf16, #tpu.memory_space<vmem>>, vector<24x8xbf16>
    %cst_49 = arith.constant dense<0.000000e+00> : vector<1x8xf32>
    %63 = tpu.matmul %59, %62, %cst_49 {dimension_numbers = #tpu.dot_dimension_numbers<[1], [0], [0], [1], [0, 0, 1, 1], [], []>} : vector<1x24xf32>, vector<24x8xbf16>, vector<1x8xf32> -> vector<1x8xf32>
    %cst_50 = arith.constant 0.055555556 : f32
    %64 = vector.broadcast %cst_50 : f32 to vector<1x8xf32>
    %65 = arith.mulf %61, %64 : vector<1x8xf32>
    %cst_51 = arith.constant 0.055555556 : f32
    %66 = vector.broadcast %cst_51 : f32 to vector<1x8xf32>
    %67 = arith.mulf %63, %66 : vector<1x8xf32>
    %68 = arith.mulf %65, %65 : vector<1x8xf32>
    %69 = arith.subf %67, %68 : vector<1x8xf32>
    %cst_52 = arith.constant 0.000000e+00 : f32
    %70 = vector.broadcast %cst_52 : f32 to vector<1x8xf32>
    %71 = arith.maximumf %69, %70 : vector<1x8xf32>
    %c0_53 = arith.constant 0 : index
    %c0_54 = arith.constant 0 : index
    %72 = vector.load %arg11[%c0_53, %c0_54] : memref<1x8xf32, #tpu.memory_space<vmem>>, vector<1x8xf32>
    %cst_55 = arith.constant 9.99999974E-6 : f32
    %73 = vector.broadcast %cst_55 : f32 to vector<1x8xf32>
    %74 = arith.addf %71, %73 : vector<1x8xf32>
    %75 = math.rsqrt %74 : vector<1x8xf32>
    %76 = arith.mulf %72, %75 : vector<1x8xf32>
    %c0_56 = arith.constant 0 : index
    %c0_57 = arith.constant 0 : index
    %77 = vector.load %arg12[%c0_56, %c0_57] : memref<1x8xf32, #tpu.memory_space<vmem>>, vector<1x8xf32>
    %78 = arith.mulf %65, %76 : vector<1x8xf32>
    %79 = arith.subf %77, %78 : vector<1x8xf32>
    %c0_58 = arith.constant 0 : index
    %c0_59 = arith.constant 0 : index
    %80 = vector.load %arg13[%c0_58, %c0_59] : memref<8x24xbf16, #tpu.memory_space<vmem>>, vector<8x24xbf16>
    %cst_60 = arith.constant dense<0.000000e+00> : vector<1x24xf32>
    %81 = tpu.matmul %76, %80, %cst_60 {dimension_numbers = #tpu.dot_dimension_numbers<[1], [0], [0], [1], [0, 0, 1, 1], [], []>} : vector<1x8xf32>, vector<8x24xbf16>, vector<1x24xf32> -> vector<1x24xf32>
    %c0_61 = arith.constant 0 : index
    %c0_62 = arith.constant 0 : index
    %82 = vector.load %arg13[%c0_61, %c0_62] : memref<8x24xbf16, #tpu.memory_space<vmem>>, vector<8x24xbf16>
    %cst_63 = arith.constant dense<0.000000e+00> : vector<1x24xf32>
    %83 = tpu.matmul %79, %82, %cst_63 {dimension_numbers = #tpu.dot_dimension_numbers<[1], [0], [0], [1], [0, 0, 1, 1], [], []>} : vector<1x8xf32>, vector<8x24xbf16>, vector<1x24xf32> -> vector<1x24xf32>
    %84 = vector.broadcast %81 : vector<1x24xf32> to vector<24x24xf32>
    %85 = arith.mulf %51, %84 : vector<24x24xf32>
    %86 = vector.broadcast %83 : vector<1x24xf32> to vector<24x24xf32>
    %87 = arith.addf %85, %86 : vector<24x24xf32>
    %cst_64 = arith.constant 0.000000e+00 : f32
    %88 = vector.broadcast %cst_64 : f32 to vector<24x24xf32>
    %89 = arith.maximumf %87, %88 : vector<24x24xf32>
    %c0_65 = arith.constant 0 : index
    %c0_66 = arith.constant 0 : index
    %90 = vector.load %arg15[%c0_65, %c0_66] : memref<24x96xbf16, #tpu.memory_space<vmem>>, vector<24x96xbf16>
    %cst_67 = arith.constant dense<0.000000e+00> : vector<24x96xf32>
    %91 = tpu.matmul %89, %90, %cst_67 {dimension_numbers = #tpu.dot_dimension_numbers<[1], [0], [0], [1], [0, 0, 1, 1], [], []>} : vector<24x24xf32>, vector<24x96xbf16>, vector<24x96xf32> -> vector<24x96xf32>
    %c0_68 = arith.constant 0 : index
    %c0_69 = arith.constant 0 : index
    %92 = vector.load %arg16[%c0_68, %c0_69] : memref<1x96xf32, #tpu.memory_space<vmem>>, vector<1x96xf32>
    %93 = vector.broadcast %92 : vector<1x96xf32> to vector<24x96xf32>
    %94 = arith.addf %91, %93 : vector<24x96xf32>
    %c0_70 = arith.constant 0 : index
    %c0_71 = arith.constant 0 : index
    %95 = vector.load %arg17[%c0_70, %c0_71] : memref<32x96xbf16, #tpu.memory_space<vmem>>, vector<32x96xbf16>
    %c0_72 = arith.constant 0 : index
    %c0_73 = arith.constant 0 : index
    %96 = vector.load %arg18[%c0_72, %c0_73] : memref<1x32xf32, #tpu.memory_space<vmem>>, vector<1x32xf32>
    %cst_74 = arith.constant 0.000000e+00 : f32
    %97 = vector.broadcast %cst_74 : f32 to vector<8x32xf32>
    %98 = vector.extract_strided_slice %94 {offsets = [0, 0], sizes = [8, 96], strides = [1, 1]} : vector<24x96xf32> to vector<8x96xf32>
    %cst_75 = arith.constant dense<0.000000e+00> : vector<8x96xf32>
    %99 = tpu.matmul %97, %95, %cst_75 {dimension_numbers = #tpu.dot_dimension_numbers<[1], [0], [0], [1], [0, 0, 1, 1], [], []>} : vector<8x32xf32>, vector<32x96xbf16>, vector<8x96xf32> -> vector<8x96xf32>
    %100 = vector.extract_strided_slice %98 {offsets = [0, 0], sizes = [8, 32], strides = [1, 1]} : vector<8x96xf32> to vector<8x32xf32>
    %101 = vector.extract_strided_slice %99 {offsets = [0, 0], sizes = [8, 32], strides = [1, 1]} : vector<8x96xf32> to vector<8x32xf32>
    %102 = arith.addf %100, %101 : vector<8x32xf32>
    %103 = arith.negf %102 : vector<8x32xf32>
    %104 = math.exp %103 : vector<8x32xf32>
    %cst_76 = arith.constant 1.000000e+00 : f32
    %105 = vector.broadcast %cst_76 : f32 to vector<8x32xf32>
    %106 = arith.addf %105, %104 : vector<8x32xf32>
    %107 = arith.divf %105, %106 : vector<8x32xf32>
    %108 = vector.extract_strided_slice %98 {offsets = [0, 32], sizes = [8, 32], strides = [1, 1]} : vector<8x96xf32> to vector<8x32xf32>
    %109 = vector.extract_strided_slice %99 {offsets = [0, 32], sizes = [8, 32], strides = [1, 1]} : vector<8x96xf32> to vector<8x32xf32>
    %110 = arith.addf %108, %109 : vector<8x32xf32>
    %111 = arith.negf %110 : vector<8x32xf32>
    %112 = math.exp %111 : vector<8x32xf32>
    %cst_77 = arith.constant 1.000000e+00 : f32
    %113 = vector.broadcast %cst_77 : f32 to vector<8x32xf32>
    %114 = arith.addf %113, %112 : vector<8x32xf32>
    %115 = arith.divf %113, %114 : vector<8x32xf32>
    %116 = vector.extract_strided_slice %98 {offsets = [0, 64], sizes = [8, 32], strides = [1, 1]} : vector<8x96xf32> to vector<8x32xf32>
    %117 = vector.extract_strided_slice %99 {offsets = [0, 64], sizes = [8, 32], strides = [1, 1]} : vector<8x96xf32> to vector<8x32xf32>
    %118 = vector.broadcast %96 : vector<1x32xf32> to vector<8x32xf32>
    %119 = arith.addf %117, %118 : vector<8x32xf32>
    %120 = arith.mulf %107, %119 : vector<8x32xf32>
    %121 = arith.addf %116, %120 : vector<8x32xf32>
    %122 = math.tanh %121 : vector<8x32xf32>
    %cst_78 = arith.constant 1.000000e+00 : f32
    %123 = vector.broadcast %cst_78 : f32 to vector<8x32xf32>
    %124 = arith.subf %123, %115 : vector<8x32xf32>
    %125 = arith.mulf %124, %122 : vector<8x32xf32>
    %126 = arith.mulf %115, %97 : vector<8x32xf32>
    %127 = arith.addf %125, %126 : vector<8x32xf32>
    %128 = vector.extract_strided_slice %94 {offsets = [8, 0], sizes = [8, 96], strides = [1, 1]} : vector<24x96xf32> to vector<8x96xf32>
    %cst_79 = arith.constant dense<0.000000e+00> : vector<8x96xf32>
    %129 = tpu.matmul %127, %95, %cst_79 {dimension_numbers = #tpu.dot_dimension_numbers<[1], [0], [0], [1], [0, 0, 1, 1], [], []>} : vector<8x32xf32>, vector<32x96xbf16>, vector<8x96xf32> -> vector<8x96xf32>
    %130 = vector.extract_strided_slice %128 {offsets = [0, 0], sizes = [8, 32], strides = [1, 1]} : vector<8x96xf32> to vector<8x32xf32>
    %131 = vector.extract_strided_slice %129 {offsets = [0, 0], sizes = [8, 32], strides = [1, 1]} : vector<8x96xf32> to vector<8x32xf32>
    %132 = arith.addf %130, %131 : vector<8x32xf32>
    %133 = arith.negf %132 : vector<8x32xf32>
    %134 = math.exp %133 : vector<8x32xf32>
    %cst_80 = arith.constant 1.000000e+00 : f32
    %135 = vector.broadcast %cst_80 : f32 to vector<8x32xf32>
    %136 = arith.addf %135, %134 : vector<8x32xf32>
    %137 = arith.divf %135, %136 : vector<8x32xf32>
    %138 = vector.extract_strided_slice %128 {offsets = [0, 32], sizes = [8, 32], strides = [1, 1]} : vector<8x96xf32> to vector<8x32xf32>
    %139 = vector.extract_strided_slice %129 {offsets = [0, 32], sizes = [8, 32], strides = [1, 1]} : vector<8x96xf32> to vector<8x32xf32>
    %140 = arith.addf %138, %139 : vector<8x32xf32>
    %141 = arith.negf %140 : vector<8x32xf32>
    %142 = math.exp %141 : vector<8x32xf32>
    %cst_81 = arith.constant 1.000000e+00 : f32
    %143 = vector.broadcast %cst_81 : f32 to vector<8x32xf32>
    %144 = arith.addf %143, %142 : vector<8x32xf32>
    %145 = arith.divf %143, %144 : vector<8x32xf32>
    %146 = vector.extract_strided_slice %128 {offsets = [0, 64], sizes = [8, 32], strides = [1, 1]} : vector<8x96xf32> to vector<8x32xf32>
    %147 = vector.extract_strided_slice %129 {offsets = [0, 64], sizes = [8, 32], strides = [1, 1]} : vector<8x96xf32> to vector<8x32xf32>
    %148 = vector.broadcast %96 : vector<1x32xf32> to vector<8x32xf32>
    %149 = arith.addf %147, %148 : vector<8x32xf32>
    %150 = arith.mulf %137, %149 : vector<8x32xf32>
    %151 = arith.addf %146, %150 : vector<8x32xf32>
    %152 = math.tanh %151 : vector<8x32xf32>
    %cst_82 = arith.constant 1.000000e+00 : f32
    %153 = vector.broadcast %cst_82 : f32 to vector<8x32xf32>
    %154 = arith.subf %153, %145 : vector<8x32xf32>
    %155 = arith.mulf %154, %152 : vector<8x32xf32>
    %156 = arith.mulf %145, %127 : vector<8x32xf32>
    %157 = arith.addf %155, %156 : vector<8x32xf32>
    %158 = vector.extract_strided_slice %94 {offsets = [16, 0], sizes = [8, 96], strides = [1, 1]} : vector<24x96xf32> to vector<8x96xf32>
    %cst_83 = arith.constant dense<0.000000e+00> : vector<8x96xf32>
    %159 = tpu.matmul %157, %95, %cst_83 {dimension_numbers = #tpu.dot_dimension_numbers<[1], [0], [0], [1], [0, 0, 1, 1], [], []>} : vector<8x32xf32>, vector<32x96xbf16>, vector<8x96xf32> -> vector<8x96xf32>
    %160 = vector.extract_strided_slice %158 {offsets = [0, 0], sizes = [8, 32], strides = [1, 1]} : vector<8x96xf32> to vector<8x32xf32>
    %161 = vector.extract_strided_slice %159 {offsets = [0, 0], sizes = [8, 32], strides = [1, 1]} : vector<8x96xf32> to vector<8x32xf32>
    %162 = arith.addf %160, %161 : vector<8x32xf32>
    %163 = arith.negf %162 : vector<8x32xf32>
    %164 = math.exp %163 : vector<8x32xf32>
    %cst_84 = arith.constant 1.000000e+00 : f32
    %165 = vector.broadcast %cst_84 : f32 to vector<8x32xf32>
    %166 = arith.addf %165, %164 : vector<8x32xf32>
    %167 = arith.divf %165, %166 : vector<8x32xf32>
    %168 = vector.extract_strided_slice %158 {offsets = [0, 32], sizes = [8, 32], strides = [1, 1]} : vector<8x96xf32> to vector<8x32xf32>
    %169 = vector.extract_strided_slice %159 {offsets = [0, 32], sizes = [8, 32], strides = [1, 1]} : vector<8x96xf32> to vector<8x32xf32>
    %170 = arith.addf %168, %169 : vector<8x32xf32>
    %171 = arith.negf %170 : vector<8x32xf32>
    %172 = math.exp %171 : vector<8x32xf32>
    %cst_85 = arith.constant 1.000000e+00 : f32
    %173 = vector.broadcast %cst_85 : f32 to vector<8x32xf32>
    %174 = arith.addf %173, %172 : vector<8x32xf32>
    %175 = arith.divf %173, %174 : vector<8x32xf32>
    %176 = vector.extract_strided_slice %158 {offsets = [0, 64], sizes = [8, 32], strides = [1, 1]} : vector<8x96xf32> to vector<8x32xf32>
    %177 = vector.extract_strided_slice %159 {offsets = [0, 64], sizes = [8, 32], strides = [1, 1]} : vector<8x96xf32> to vector<8x32xf32>
    %178 = vector.broadcast %96 : vector<1x32xf32> to vector<8x32xf32>
    %179 = arith.addf %177, %178 : vector<8x32xf32>
    %180 = arith.mulf %167, %179 : vector<8x32xf32>
    %181 = arith.addf %176, %180 : vector<8x32xf32>
    %182 = math.tanh %181 : vector<8x32xf32>
    %cst_86 = arith.constant 1.000000e+00 : f32
    %183 = vector.broadcast %cst_86 : f32 to vector<8x32xf32>
    %184 = arith.subf %183, %175 : vector<8x32xf32>
    %185 = arith.mulf %184, %182 : vector<8x32xf32>
    %186 = arith.mulf %175, %157 : vector<8x32xf32>
    %187 = arith.addf %185, %186 : vector<8x32xf32>
    %c0_87 = arith.constant 0 : index
    %c0_88 = arith.constant 0 : index
    %188 = vector.load %arg19[%c0_87, %c0_88] : memref<32x32xbf16, #tpu.memory_space<vmem>>, vector<32x32xbf16>
    %cst_89 = arith.constant dense<0.000000e+00> : vector<8x32xf32>
    %189 = tpu.matmul %187, %188, %cst_89 {dimension_numbers = #tpu.dot_dimension_numbers<[1], [0], [0], [1], [0, 0, 1, 1], [], []>} : vector<8x32xf32>, vector<32x32xbf16>, vector<8x32xf32> -> vector<8x32xf32>
    %c0_90 = arith.constant 0 : index
    %c0_91 = arith.constant 0 : index
    %190 = vector.load %arg20[%c0_90, %c0_91] : memref<1x32xf32, #tpu.memory_space<vmem>>, vector<1x32xf32>
    %191 = vector.broadcast %190 : vector<1x32xf32> to vector<8x32xf32>
    %192 = arith.addf %189, %191 : vector<8x32xf32>
    %193 = math.tanh %192 : vector<8x32xf32>
    %194 = vector.extract_strided_slice %193 {offsets = [0, 0], sizes = [2, 32], strides = [1, 1]} : vector<8x32xf32> to vector<2x32xf32>
    %c0_92 = arith.constant 0 : index
    %c0_93 = arith.constant 0 : index
    %195 = vector.load %arg21[%c0_92, %c0_93] : memref<2x32xf32, #tpu.memory_space<vmem>>, vector<2x32xf32>
    tpu.vector_store %arg21[%c0_92, %c0_93], %194 {strides = array<i32>} : memref<2x32xf32, #tpu.memory_space<vmem>>, vector<2x32xf32>,
    return
  }
}

</mosaic_0001>

<bundles_post_ra>
// kernel: mul.18
= control target key start
LH: loop header
LB: loop body
LE: loop exit
PB: predicated region body
PF: predicated region fallthrough
CT: control target
= control target key end

     0   :  { %vm39_vm0 = vcmask 64512   ;;  %s170_s0 = inlined_call_operand.vmem [shape: f32[3,3,4,8], index: 0, kind: input, shape index: {}]   ;;  %s171_s1 = inlined_call_operand.vmem [shape: f32[36,8], index: 1, kind: output, shape index: {}]  }
   0x1   :  { %v81_v0 = vld [vmem:[%s170_s0 + $0x20] sm:$0xf]  ;;  %v82_v1 = vld [vmem:[%s170_s0 + $0x1c] sm:$0xf]  ;;  %v83_v2 = vld [vmem:[%s170_s0 + $0x18] sm:$0xf] }
   0x2   :  { %7 = vst [vmem:[#allocation0 + $0x10] sm:$0xf] %v81_v0  ;;  %v84_v3 = vld [vmem:[%s170_s0 + $0x14] sm:$0xf]  ;;  %v85_v4 = vld [vmem:[%s170_s0 + $0x10] sm:$0xf] }
   0x3   :  { %11 = vst [vmem:[#allocation0 + $0x40] sm:$0xf] %v82_v1  ;;  %v86_v5 = vld [vmem:[%s170_s0 + $0xc] sm:$0xf]  ;;  %v87_v6 = vld [vmem:[%s170_s0 + $0x8] sm:$0xf] }
   0x4   :  { %15 = vst [vmem:[#allocation0 + $0x28] sm:$0xf] %v83_v2  ;;  %v88_v7 = vld [vmem:[%s170_s0 + $0x4] sm:$0xf]  ;;  %v36_v8 = vld [vmem:[%s170_s0] sm:$0xf] }
   0x5   :  { %19 = vst [vmem:[#allocation0 + $0x30] sm:$0xf] %v84_v3 }
   0x6   :  { %23 = vst [vmem:[#allocation0 + $0x20] sm:$0xf] %v85_v4 }
   0x7   :  { %27 = vst [vmem:[#allocation0 + $0x18] sm:$0xf] %v86_v5 }
   0x8   :  { %31 = vst [vmem:[#allocation0] sm:$0xf] %v87_v6 }
   0x9   :  { %35 = vst [vmem:[#allocation0 + $0x8] sm:$0xf] %v88_v7  ;;  %v77_v16 = vld [vmem:[#allocation0 + $0x10] sm:$0xf]  }
   0xa   :  { %37 = vst [vmem:[#allocation0 + $0x38] sm:$0xf] %v36_v8  ;;  %v72_v9 = vld [vmem:[#allocation0 + $0x40] sm:$0xf]  }
   0xb   :  { %v67_v10 = vld [vmem:[#allocation0 + $0x28] sm:$0xf]   ;;  %95 = vst.msk [vmem:[%s171_s1 + $0x1c] sm:$0xf] %vm39_vm0, %v72_v9  }
   0xc   :  { %v62_v11 = vld [vmem:[#allocation0 + $0x30] sm:$0xf]   ;;  %94 = vst.msk [vmem:[%s171_s1 + $0x18] sm:$0xf] %vm39_vm0, %v67_v10  }
   0xd   :  { %v57_v12 = vld [vmem:[#allocation0 + $0x20] sm:$0xf]   ;;  %93 = vst.msk [vmem:[%s171_s1 + $0x14] sm:$0xf] %vm39_vm0, %v62_v11  }
   0xe   :  { %v52_v13 = vld [vmem:[#allocation0 + $0x18] sm:$0xf]   ;;  %92 = vst.msk [vmem:[%s171_s1 + $0x10] sm:$0xf] %vm39_vm0, %v57_v12  }
   0xf   :  { %v47_v14 = vld [vmem:[#allocation0] sm:$0xf]   ;;  %91 = vst.msk [vmem:[%s171_s1 + $0xc] sm:$0xf] %vm39_vm0, %v52_v13  }
  0x10   :  { %v42_v15 = vld [vmem:[#allocation0 + $0x8] sm:$0xf]   ;;  %90 = vst.msk [vmem:[%s171_s1 + $0x8] sm:$0xf] %vm39_vm0, %v47_v14  }
  0x11   :  { %v38_v17 = vld [vmem:[#allocation0 + $0x38] sm:$0xf]   ;;  %89 = vst.msk [vmem:[%s171_s1 + $0x4] sm:$0xf] %vm39_vm0, %v42_v15  }
  0x12   :  { %40 = vst.msk [vmem:[%s171_s1] sm:$0xf] %vm39_vm0, %v38_v17  }
  0x13   :  { %96 = vst.msk [vmem:[%s171_s1 + $0x20] sm:$0xf] %vm39_vm0, %v77_v16  }

// kernel: reference_encoder_forward.1
= control target key start
LH: loop header
LB: loop body
LE: loop exit
PB: predicated region body
PF: predicated region fallthrough
CT: control target
= control target key end

     0   :  { %s1797_s0 = inlined_call_operand.vmem [shape: bf16[98,9], index: 0, kind: input, shape index: {}]   ;;  %s1798_s1 = inlined_call_operand.vmem [shape: bf16[24,243], index: 1, kind: input, shape index: {}]   ;;  %s1799_s2 = inlined_call_operand.vmem [shape: f32[24,1], index: 2, kind: input, shape index: {}]   ;;  %s1800_s3 = inlined_call_operand.vmem [shape: bf16[9,4], index: 3, kind: input, shape index: {}]   ;;  %s1801_s4 = inlined_call_operand.vmem [shape: f32[1,4], index: 4, kind: input, shape index: {}]   ;;  %s1802_s5 = inlined_call_operand.vmem [shape: f32[1,4], index: 5, kind: input, shape index: {}]   ;;  %s1803_s6 = inlined_call_operand.vmem [shape: f32[1,4], index: 6, kind: input, shape index: {}]   ;;  %s1804_s7 = inlined_call_operand.vmem [shape: bf16[4,108], index: 7, kind: input, shape index: {}]   ;;  %s1805_s8 = inlined_call_operand.vmem [shape: bf16[243,108], index: 8, kind: input, shape index: {}]   ;;  %s1806_s9 = inlined_call_operand.vmem [shape: bf16[108,24], index: 9, kind: input, shape index: {}]   ;;  %s1807_s10 = inlined_call_operand.vmem [shape: f32[1,8], index: 10, kind: input, shape index: {}]   ;;  %s1808_s11 = inlined_call_operand.vmem [shape: f32[1,8], index: 11, kind: input, shape index: {}]   ;;  %s1809_s12 = inlined_call_operand.vmem [shape: f32[1,8], index: 12, kind: input, shape index: {}]   ;;  %s1810_s13 = inlined_call_operand.vmem [shape: bf16[8,24], index: 13, kind: input, shape index: {}]   ;;  %s1811_s14 = inlined_call_operand.vmem [shape: bf16[24,8], index: 14, kind: input, shape index: {}]   ;;  %s1812_s15 = inlined_call_operand.vmem [shape: bf16[24,96], index: 15, kind: input, shape index: {}]   ;;  %s1813_s16 = inlined_call_operand.vmem [shape: f32[1,96], index: 16, kind: input, shape index: {}]   ;;  %s1814_s17 = inlined_call_operand.vmem [shape: bf16[32,96], index: 17, kind: input, shape index: {}]   ;;  %s1815_s18 = inlined_call_operand.vmem [shape: f32[1,32], index: 18, kind: input, shape index: {}]   ;;  %s1816_s19 = inlined_call_operand.vmem [shape: bf16[32,32], index: 19, kind: input, shape index: {}]   ;;  %s1817_s20 = inlined_call_operand.vmem [shape: f32[1,32], index: 20, kind: input, shape index: {}]   ;;  %s1818_s21 = inlined_call_operand.hbm [shape: f32[2,32], index: 21, kind: output, shape index: {}]  }
   0x1   :  { %1824 = sst [smem:[#allocation5_spill]] %s1797_s0 }
   0x2   :  { %1825 = sst [smem:[#allocation6_spill]] %s1798_s1 }
   0x3   :  { %1826 = sst [smem:[#allocation7_spill]] %s1799_s2 }
   0x4   :  { %1827 = sst [smem:[#allocation8_spill]] %s1800_s3 }
   0x5   :  { %1828 = sst [smem:[#allocation9_spill]] %s1801_s4 }
   0x6   :  { %1829 = sst [smem:[#allocation10_spill]] %s1802_s5 }
   0x7   :  { %s1830_s26 = sld [smem:[#allocation8_spill]]  ;;  %vm149_vm0 = vcmask 1043456   ;;  %vm150_vm1 = vcmask 1044480   ;;  %v1382_v3 = vmov 65535  }
   0x8   :  { %v151_v4 = vsel %vm149_vm0, 4294967295, %v1382_v3 }
   0x9   :  { %v152_v5 = vsel %vm150_vm1, %v151_v4, 0 }
   0xd   :  { %v1132_v0 = vld [vmem:[%s1830_s26] sm:$0xf]  ;;  %v1289_v1 = vld [vmem:[%s1830_s26] sm:$0x10] }
   0xe   :  { %v1133_v2 = vor.u32 %v1289_v1, %v1132_v0 }
   0xf   :  { %26 = vsyncpa [#allocation3], 0  ;;  %s1831_s0 = sld [smem:[#allocation5_spill]]  ;;  %vm127_vm2 = vcmask 72704   ;;  %vm199_vm3 = vcmask 31744   ;;  %vm301_vm4 = vcmask 1041408  }
  0x10   :  { %v154_v6 = vand.u32 %v1133_v2, %v152_v5  ;;  %s1832_s4 = sld [smem:[#allocation9_spill]]  ;;  %v297_v0 = vld [vmem:[%s1804_s7] sm:$0x3]  ;;  %v1299_v1 = vld [vmem:[%s1805_s8 + $0x38] sm:$0xff]  ;;  %vm496_vm5 = vcmask 1040384   ;;  %vm223_vm6 = vcmask 25600  }
  0x11   :  { %v303_v5 = vsel %vm301_vm4, %v297_v0, 0  ;;  %v1303_v0 = vld [vmem:[%s1805_s8 + $0x58] sm:$0xff]  ;;  %s1833_s7 = sld [smem:[#allocation10_spill]]  ;;  %vm489_vm10 = vcmask 941056   ;;  %vm636_vm11 = vcmask 1045504   ;;  %vm551_vm12 = vcmask 64512  }
  0x12   :  { %163 = vmatpush.bf16.msra.mxu0 %v154_v6  ;;  %v379_v6 = vld [vmem:[%s1805_s8 + $0x78] sm:$0x3]  ;;  %312 = vmatpush.bf16.msra.mxu1 %v303_v5  ;;  %s1834_s3 = sld [smem:[#allocation6_spill]]  ;;  %vm626_vm13 = vcmask 883712   ;;  %vm679_vm14 = vcmask 195584   ;;  %s1384_s29 = smov 64  }
  0x13   :  { %327 = vmatpush.bf16.msra.mxu2 %v303_v5  ;;  %341 = vmatpush.bf16.msra.mxu3 %v303_v5  ;;  %s1835_s22 = sld [smem:[#allocation7_spill]]  ;;  %s1387_s24 = smov [#allocation2]  }
  0x14   :  { %s1097_s25 = sshll.u32 %s1818_s21, 4  ;;  %s1098_s25 = int_to_ptr.hbm [resolvable:$true] %s1097_s25 }
  0x15   :  { %v1283_v7 = vld [vmem:[%s1831_s0] sm:$0xff]  ;;  %v1284_v8 = vld [vmem:[%s1831_s0 + $0x8] sm:$0xff]  ;;  %v1285_v9 = vld [vmem:[%s1831_s0 + $0x10] sm:$0xff] }
  0x16   :  { %1134 = vmatmul.msk.bf16.vlgmr.msra.gmra.mxu0 %vm127_vm2, %v1283_v7  ;;  %v1286_v10 = vld [vmem:[%s1831_s0 + $0x18] sm:$0xff]  ;;  %v1287_v11 = vld [vmem:[%s1831_s0 + $0x20] sm:$0xff]  ;;  %v1288_v12 = vld [vmem:[%s1831_s0 + $0x28] sm:$0xff]  ;;  %v497_v7 = vsel %vm496_vm5, 4294967295, %v1382_v3  ;;  %502 = vmatpush.bf16.msrb.mxu1 %v1299_v1 }
  0x17   :  { %v82_v13 = vld [vmem:[%s1831_s0 + $0x30] sm:$0x1]  ;;  %v1530_v17 = vld [vmem:[%s1832_s4] ss:$0 sm:$0xff] }
  0x18   :  { %v114_v14 = vunpack.c.l.b16 %v82_v13  ;;  %v1298_v3 = vld [vmem:[%s1805_s8 + $0x30] sm:$0xff] }
  0x1a   :  { %v121_v15 = vpack.c.b16 %v114_v14, %v114_v14  ;;  %503 = vmatpush.bf16.msrb.mxu1 %v1298_v3 }
  0x26   :  { %1135 = vmatmul.msk.bf16.gmra.mxu0 %vm127_vm2, %v1284_v8 }
  0x36   :  { %1136 = vmatmul.msk.bf16.gmra.mxu0 %vm127_vm2, %v1285_v9 }
  0x46   :  { %1137 = vmatmul.msk.bf16.gmra.mxu0 %vm127_vm2, %v1286_v10 }
  0x56   :  { %1138 = vmatmul.msk.bf16.gmra.mxu0 %vm127_vm2, %v1287_v11  ;;  %v457_v11 = vunpack.c.l.b16 %v379_v6 }
  0x66   :  { %1139 = vmatmul.msk.bf16.gmra.mxu0 %vm127_vm2, %v1288_v12  ;;  %v85_v12 = vld [vmem:[%s1832_s4] sm:$0x1] }
  0x67   :  { %1143 = vmatmul.msk.f32.vlgmr.msra.gmra.mxu3 %vm199_vm3, %v85_v12 }
  0x76   :  { %1140 = vmatmul.msk.bf16.gmra.mxu0 %vm127_vm2, %v121_v15 }
  0x93   :  { %v165_v16 = vpop.f32.mrf.mxu0 }
  0x94   :  { %v166_v18 = vadd.f32 %v1530_v17, %v165_v16  ;;  %v498_v16 = vsel %vm301_vm4, %v497_v7, 0 }
  0x96   :  { %v233_v20 = vmul.f32 %v166_v18, %v166_v18  ;;  %v200_v22 = vsel %vm199_vm3, %v166_v18, 0.0 }
  0x98   :  { %v246_v26 = vsel %vm199_vm3, %v233_v20, 0.0 }
  0x9b   :  { %v167_v19 = vpop.f32.mrf.mxu0 }
  0x9c   :  { %v168_v21 = vadd.f32 %v1530_v17, %v167_v19 }
  0x9e   :  { %v201_v23 = vsel %vm199_vm3, %v168_v21, 0.0  ;;  %v234_v24 = vmul.f32 %v168_v21, %v168_v21  ;;  %v473_v21 = vpack.c.b16 %v457_v11, %v457_v11 }
  0x9f   :  { %v202_v25 = vadd.f32 %v201_v23, %v200_v22 }
  0xa0   :  { %v247_v27 = vsel %vm199_vm3, %v234_v24, 0.0 }
  0xa1   :  { %v248_v28 = vadd.f32 %v247_v27, %v246_v26 }
  0xa3   :  { %v170_v29 = vpop.f32.mrf.mxu0 }
  0xa4   :  { %v171_v36 = vadd.f32 %v1530_v17, %v170_v29 }
  0xa6   :  { %v235_v39 = vmul.f32 %v171_v36, %v171_v36  ;;  %v203_v43 = vsel %vm199_vm3, %v171_v36, 0.0 }
  0xa7   :  { %v204_v50 = vadd.f32 %v203_v43, %v202_v25  ;;  %v1296_v43 = vld [vmem:[%s1805_s8 + $0x20] sm:$0xff] }
  0xa8   :  { %v249_v44 = vsel %vm199_vm3, %v235_v39, 0.0 }
  0xa9   :  { %v250_v51 = vadd.f32 %v249_v44, %v248_v28  ;;  %v500_v28 = vand.u32 %v498_v16, %v473_v21 }
  0xab   :  { %v172_v30 = vpop.f32.mrf.mxu0  ;;  %520 = vmatpush.bf16.msrb.mxu2 %v500_v28 }
  0xac   :  { %v173_v37 = vadd.f32 %v1530_v17, %v172_v30 }
  0xae   :  { %v236_v40 = vmul.f32 %v173_v37, %v173_v37  ;;  %v205_v46 = vsel %vm199_vm3, %v173_v37, 0.0 }
  0xaf   :  { %v206_v55 = vadd.f32 %v205_v46, %v204_v50 }
  0xb0   :  { %v251_v47 = vsel %vm199_vm3, %v236_v40, 0.0 }
  0xb1   :  { %v252_v56 = vadd.f32 %v251_v47, %v250_v51  ;;  %v1305_v47 = vld [vmem:[%s1805_s8 + $0x68] sm:$0xff] }
  0xb3   :  { %v175_v31 = vpop.f32.mrf.mxu0 }
  0xb4   :  { %v176_v41 = vadd.f32 %v1530_v17, %v175_v31 }
  0xb6   :  { %v237_v48 = vmul.f32 %v176_v41, %v176_v41  ;;  %v207_v53 = vsel %vm199_vm3, %v176_v41, 0.0 }
  0xb7   :  { %v208_v62 = vadd.f32 %v207_v53, %v206_v55 }
  0xb8   :  { %v253_v58 = vsel %vm199_vm3, %v237_v48, 0.0 }
  0xb9   :  { %v254_v8 = vadd.f32 %v253_v58, %v252_v56 }
  0xbb   :  { %v177_v32 = vpop.f32.mrf.mxu0 }
  0xbc   :  { %v178_v42 = vadd.f32 %v1530_v17, %v177_v32  ;;  %v1297_v32 = vld [vmem:[%s1805_s8 + $0x28] sm:$0xff] }
  0xbd   :  { %504 = vmatpush.bf16.msrb.mxu1 %v1297_v32 }
  0xbe   :  { %v238_v49 = vmul.f32 %v178_v42, %v178_v42  ;;  %v209_v59 = vsel %vm199_vm3, %v178_v42, 0.0 }
  0xbf   :  { %v210_v9 = vadd.f32 %v209_v59, %v208_v62 }
  0xc0   :  { %v255_v60 = vsel %vm199_vm3, %v238_v49, 0.0 }
  0xc1   :  { %v256_v18 = vadd.f32 %v255_v60, %v254_v8  ;;  %505 = vmatpush.bf16.msrb.mxu1 %v1296_v43  ;;  %v1293_v8 = vld [vmem:[%s1805_s8 + $0x8] sm:$0xff] }
  0xc3   :  { %v180_v33 = vpop.f32.mrf.mxu0 }
  0xc4   :  { %v181_v45 = vadd.f32 %v1530_v17, %v180_v33 }
  0xc6   :  { %v239_v57 = vmul.f32 %v181_v45, %v181_v45  ;;  %v211_v63 = vsel %vm199_vm3, %v181_v45, 0.0 }
  0xc7   :  { %v212_v19 = vadd.f32 %v211_v63, %v210_v9  ;;  %v1302_v9 = vld [vmem:[%s1805_s8 + $0x50] sm:$0xff] }
  0xc8   :  { %v257_v10 = vsel %vm199_vm3, %v239_v57, 0.0  ;;  %v1304_v57 = vld [vmem:[%s1805_s8 + $0x60] sm:$0xff] }
  0xc9   :  { %v258_v26 = vadd.f32 %v257_v10, %v256_v18 }
  0xcb   :  { %v182_v34 = vpop.f32.mrf.mxu0 }
  0xcc   :  { %v183_v54 = vadd.f32 %v1530_v17, %v182_v34 }
  0xce   :  { %v240_v2 = vmul.f32 %v183_v54, %v183_v54  ;;  %v213_v13 = vsel %vm199_vm3, %v183_v54, 0.0  ;;  %v1295_v54 = vld [vmem:[%s1805_s8 + $0x18] sm:$0xff] }
  0xcf   :  { %v214_v27 = vadd.f32 %v213_v13, %v212_v19  ;;  %506 = vmatpush.bf16.msrb.mxu1 %v1295_v54  ;;  %v1300_v19 = vld [vmem:[%s1805_s8 + $0x40] sm:$0xff]  ;;  %v1309_v54 = vld [vmem:[%s1806_s9 + $0x10] sm:$0xff] }
  0xd0   :  { %v259_v22 = vsel %vm199_vm3, %v240_v2, 0.0 }
  0xd1   :  { %v260_v33 = vadd.f32 %v259_v22, %v258_v26 }
  0xd3   :  { %v185_v35 = vpop.f32.mrf.mxu0 }
  0xd4   :  { %v186_v61 = vadd.f32 %v1530_v17, %v185_v35  ;;  %v1306_v35 = vld [vmem:[%s1805_s8 + $0x70] sm:$0xff] }
  0xd5   :  { %521 = vmatpush.bf16.msrb.mxu2 %v1306_v35  ;;  %v1146_v35 = vld [vmem:[%s1834_s3] sm:$0xf] }
  0xd6   :  { %v241_v14 = vmul.f32 %v186_v61, %v186_v61  ;;  %v215_v23 = vsel %vm199_vm3, %v186_v61, 0.0 }
  0xd7   :  { %v216_v34 = vadd.f32 %v215_v23, %v214_v27  ;;  %v281_v27 = vld [vmem:[%s1833_s7] sm:$0x1] }
  0xd8   :  { %v261_v29 = vsel %vm199_vm3, %v241_v14, 0.0  ;;  %v1292_v14 = vld [vmem:[%s1805_s8] sm:$0xff] }
  0xd9   :  { %v262_v39 = vadd.f32 %v261_v29, %v260_v33  ;;  %522 = vmatpush.bf16.msrb.mxu2 %v1305_v47  ;;  %v550_v29 = vld [vmem:[%s1810_s13] sm:$0xf]  ;;  %v1241_v47 = vld [vmem:[%s1806_s9 + $0x30] sm:$0xf] }
  0xda   :  { %v294_v33 = vld [vmem:[%s1803_s6] sm:$0x1] }
  0xdb   :  { %v187_v38 = vpop.f32.mrf.mxu0 }
  0xdc   :  { %v188_v4 = vadd.f32 %v1530_v17, %v187_v38 }
  0xdd   :  { %523 = vmatpush.bf16.msrb.mxu2 %v1304_v57  ;;  %v1307_v57 = vld [vmem:[%s1806_s9] sm:$0xff] }
  0xde   :  { %v242_v24 = vmul.f32 %v188_v4, %v188_v4  ;;  %v217_v30 = vsel %vm199_vm3, %v188_v4, 0.0 }
  0xdf   :  { %v218_v40 = vadd.f32 %v217_v30, %v216_v34 }
  0xe0   :  { %v263_v36 = vsel %vm199_vm3, %v242_v24, 0.0 }
  0xe1   :  { %v264_v44 = vadd.f32 %v263_v36, %v262_v39  ;;  %524 = vmatpush.bf16.msrb.mxu2 %v1303_v0  ;;  %v1291_v36 = vld [vmem:[%s1834_s3 + $0x4] sm:$0xf0]  ;;  %v1290_v39 = vld [vmem:[%s1834_s3 + $0x4] sm:$0xf]  ;;  %v660_v0 = vld [vmem:[%s1835_s22 + $0x10] sm:$0xff] }
  0xe3   :  { %v190_v52 = vpop.f32.mrf.mxu0 }
  0xe4   :  { %v191_v15 = vadd.f32 %v1530_v17, %v190_v52 }
  0xe5   :  { %525 = vmatpush.bf16.msrb.mxu2 %v1302_v9 }
  0xe6   :  { %v243_v31 = vmul.f32 %v191_v15, %v191_v15  ;;  %v219_v37 = vsel %vm199_vm3, %v191_v15, 0.0  ;;  %v1301_v15 = vld [vmem:[%s1805_s8 + $0x48] sm:$0xff] }
  0xe7   :  { %v220_v45 = vadd.f32 %v219_v37, %v218_v40  ;;  %v1148_v40 = vld [vmem:[%s1834_s3 + $0x8] sm:$0xf0] }
  0xe8   :  { %v265_v41 = vsel %vm199_vm3, %v243_v31, 0.0  ;;  %v1634_v31 = vsel %vm149_vm0, %v550_v29, 0 }
  0xe9   :  { %v266_v50 = vadd.f32 %v265_v41, %v264_v44  ;;  %526 = vmatpush.bf16.msrb.mxu2 %v1301_v15  ;;  %565 = vmatpush.bf16.msrb.mxu3 %v1634_v31  ;;  %v1151_v41 = vor.u32 %v1290_v39, %v1148_v40 }
  0xeb   :  { %v192_v20 = vpop.f32.mrf.mxu0 }
  0xec   :  { %v193_v25 = vadd.f32 %v1530_v17, %v192_v20 }
  0xed   :  { %527 = vmatpush.bf16.msrb.mxu2 %v1300_v19 }
  0xee   :  { %v244_v38 = vmul.f32 %v193_v25, %v193_v25  ;;  %v221_v42 = vsel %vm199_vm3, %v193_v25, 0.0 }
  0xef   :  { %v222_v51 = vadd.f32 %v221_v42, %v220_v45  ;;  %v348_v42 = vld [vmem:[%s1834_s3 + $0x10] sm:$0xff] }
  0xf0   :  { %v267_v48 = vsel %vm199_vm3, %v244_v38, 0.0  ;;  %v1147_v38 = vor.u32 %v1291_v36, %v1146_v35  ;;  %v388_v43 = vunpack.c.l.b16 %v348_v42  ;;  %v389_v44 = vunpack.c.h.b16 %v348_v42 }
  0xf1   :  { %v268_v55 = vadd.f32 %v267_v48, %v266_v50  ;;  %v1313_v48 = vld [vmem:[%s1806_s9 + $0x30] sm:$0x30] }
  0xf2   :  { %v392_v45 = vpack.c.b16 %v388_v43, %v388_v43 }
  0xf3   :  { %v195_v46 = vpop.f32.mrf.mxu0 }
  0xf4   :  { %v196_v49 = vadd.f32 %v1530_v17, %v195_v46  ;;  %v1294_v17 = vld [vmem:[%s1805_s8 + $0x10] sm:$0xff]  ;;  %v393_v46 = vpack.c.b16 %v389_v44, %v389_v44 }
  0xf5   :  { %507 = vmatpush.bf16.msrb.mxu1 %v1294_v17 }
  0xf6   :  { %v224_v52 = vsel %vm223_vm6, %v196_v49, 0.0  ;;  %v245_v53 = vmul.f32 %v196_v49, %v196_v49  ;;  %v1242_v49 = vor.u32 %v1313_v48, %v1241_v47 }
  0xf7   :  { %v225_v56 = vadd.f32 %v224_v52, %v222_v51  ;;  %v1312_v51 = vld [vmem:[%s1806_s9 + $0x28] sm:$0xff]  ;;  %v1311_v52 = vld [vmem:[%s1806_s9 + $0x20] sm:$0xff] }
  0xf8   :  { %v269_v58 = vsel %vm223_vm6, %v245_v53, 0.0  ;;  %v638_v50 = vsel %vm636_vm11, %v1242_v49, 0  ;;  %v1310_v53 = vld [vmem:[%s1806_s9 + $0x18] sm:$0xff]  ;;  %vm875_vm6 = vcmask 261120  }
  0xf9   :  { %v226_v59 = vrot.slane %v225_v56, 4  ;;  %v270_v60 = vadd.f32 %v269_v58, %v268_v55  ;;  %508 = vmatpush.bf16.msrb.mxu1 %v1293_v8  ;;  %641 = vmatpush.bf16.msra.mxu3 %v638_v50  ;;  %v549_v55 = vld [vmem:[%s1807_s10] sm:$0x1] }
  0xfa   :  { %1214 = vmatmul.msk.f32.vlgmr.msrb.gmra.mxu3 %vm551_vm12, %v549_v55 }
  0xfb   :  { %v227_v61 = vadd.f32 %v226_v59, %v225_v56  ;;  %v271_v62 = vrot.slane %v270_v60, 4  ;;  %v197_v63 = vpop.f32.mrf.mxu0  ;;  %v1308_v56 = vld [vmem:[%s1806_s9 + $0x8] sm:$0xff] }
  0xfc   :  { %v658_v63 = vld [vmem:[%s1835_s22] sm:$0xff] }
  0xfd   :  { %v228_v1 = vrot.slane %v227_v61, 2  ;;  %v272_v2 = vadd.f32 %v271_v62, %v270_v60  ;;  %509 = vmatpush.bf16.msrb.mxu1 %v1292_v14  ;;  %642 = vmatpush.bf16.msra.mxu3 %v1312_v51  ;;  %v343_v60 = vpop.f32.mrf.mxu3  ;;  %v1383_v62 = vmov 0  }
  0xfe   :  { %1326 = vset.pattern.permute.xlu0 %v1383_v62  ;;  %1327 = vset.pattern.permute.xlu1 %v1383_v62 }
  0xff   :  { %v229_v4 = vadd.f32 %v228_v1, %v227_v61  ;;  %v273_v5 = vrot.slane %v272_v2, 2  ;;  %v380_v61 = vperm.slane %v343_v60, 0  ;;  %663 = vperm.xlu0 %1326, %v658_v63   ;;  %673 = vperm.xlu1 %1327, %v660_v0  }
 0x101   :  { %v230_v6 = vrot.slane %v229_v4, 1  ;;  %v274_v7 = vadd.f32 %v273_v5, %v272_v2  ;;  %643 = vmatpush.bf16.msra.mxu3 %v1311_v52 }
 0x103   :  { %v231_v10 = vadd.f32 %v230_v6, %v229_v4  ;;  %v275_v11 = vrot.slane %v274_v7, 1  ;;  %v659_v4 = vld [vmem:[%s1835_s22 + $0x8] sm:$0xff] }
 0x105   :  { %v232_v12 = vmul.f32 0.010204081, %v231_v10  ;;  %v276_v13 = vadd.f32 %v275_v11, %v274_v7  ;;  %644 = vmatpush.bf16.msra.mxu3 %v1310_v53 }
 0x107   :  { %v277_v3 = vmul.f32 0.010204081, %v276_v13  ;;  %v278_v16 = vmul.f32 %v232_v12, %v232_v12  ;;  %668 = vperm.xlu0 %1326, %v659_v4  }
 0x109   :  { %v279_v18 = vsub.f32 %v277_v3, %v278_v16  ;;  %645 = vmatpush.bf16.msra.mxu3 %v1309_v54 }
 0x10b   :  { %v280_v20 = vmax.f32 %v279_v18, 0.0 }
 0x10d   :  { %v282_v21 = vadd.f32 1e-05, %v280_v20  ;;  %646 = vmatpush.bf16.msra.mxu3 %v1308_v56 }
 0x10f   :  { %1332 = vrsqrt.f32 %v282_v21  ;;  %vm289_vm8 = vweird.f32 %v282_v21 }
 0x111   :  { %647 = vmatpush.bf16.msra.mxu3 %v1307_v57 }
 0x115   :  { %v1333_v22 = vpop.eup %1332 }
 0x116   :  { %v284_v23 = vmul.f32 %v1333_v22, %v282_v21  ;;  %vm290_vm7 = vweird.f32 %v1333_v22 }
 0x117   :  { %vm291_vm9 = vmor %vm289_vm8, %vm290_vm7 }
 0x118   :  { %v285_v24 = vmul.f32 %v1333_v22, %v284_v23 }
 0x11a   :  { %v286_v25 = vmul.f32 0.5, %v285_v24 }
 0x11c   :  { %v287_v26 = vsub.f32 1.5, %v286_v25 }
 0x11e   :  { %v288_v28 = vmul.f32 %v1333_v22, %v287_v26 }
 0x120   :  { %v292_v30 = vsel %vm291_vm9, %v1333_v22, %v288_v28 }
 0x121   :  { %v293_v32 = vmul.f32 %v292_v30, %v281_v27  ;;  %v707_v27 = vld [vmem:[%s1811_s14 + $0x8] sm:$0xf] }
 0x122   :  { %v713_v28 = vunpack.c.l.b16 %v707_v27  ;;  %v768_v27 = vld [vmem:[%s1809_s12] sm:$0x1] }
 0x123   :  { %1141 = vmatmul.msk.f32.vlgmr.msra.gmra.mxu1 %vm199_vm3, %v293_v32  ;;  %v295_v34 = vmul.f32 %v293_v32, %v232_v12 }
 0x124   :  { %v715_v29 = vpack.c.b16 %v713_v28, %v713_v28 }
 0x125   :  { %v296_v37 = vsub.f32 %v294_v33, %v295_v34  ;;  %v1314_v33 = vld [vmem:[%s1811_s14] sm:$0xff] }
 0x126   :  { %v721_v30 = vsel %vm149_vm0, %v715_v29, 0 }
 0x127   :  { %1142 = vmatmul.msk.f32.vlgmr.msra.gmra.mxu2 %vm199_vm3, %v296_v37  ;;  %729 = vmatpush.bf16.msrb.mxu3 %v721_v30 }
 0x128   :  { %781 = vmatpush.bf16.msra.mxu2 %v1634_v31  ;;  %744 = vmatpush.bf16.msra.mxu1 %v721_v30  ;;  %v1385_v30 = vmov 0.0  }
 0x12b   :  { %510 = vmatmul.bf16.vlgmr.msrb.gmra.mxu1 %v1147_v38  ;;  %730 = vmatpush.bf16.msrb.mxu3 %v1314_v33 }
 0x12c   :  { %745 = vmatpush.bf16.msra.mxu1 %v1314_v33 }
 0x12f   :  { %1212 = vmatmul.msk.bf16.vlgmr.msrb.gmra.mxu2 %vm489_vm10, %v1151_v41 }
 0x13b   :  { %515 = vmatmul.bf16.gmra.mxu1 %v392_v45 }
 0x13f   :  { %1213 = vmatmul.msk.bf16.gmra.mxu2 %vm489_vm10, %v393_v46 }
 0x171   :  { %v664_v34 = vpop.permute.xlu0 %663  ;;  %v674_v45 = vpop.permute.xlu1 %673 }
 0x179   :  { %v669_v40 = vpop.permute.xlu0 %668 }
 0x17d   :  { %v567_v32 = vpop.f32.mrf.mxu3 }
 0x17e   :  { %v584_v36 = vperm.slane %v567_v32, 0  ;;  %v814_v32 = vld [vmem:[%s1812_s15 + $0x8] sm:$0xf] }
 0x17f   :  { %v824_v33 = vunpack.c.l.b16 %v814_v32 }
 0x1a0   :  { %v314_v58 = vpop.f32.mrf.mxu1 }
 0x1a1   :  { %v538_v6 = vperm.slane %v314_v58, 0 }
 0x1a8   :  { %v511_v59 = vpop.f32.mrf.mxu1 }
 0x1a9   :  { %v512_v1 = vadd.f32 %v511_v59, %v380_v61 }
 0x1aa   :  { %v329_v17 = vpop.f32.mrf.mxu2 }
 0x1ab   :  { %v542_v8 = vperm.slane %v329_v17, 0 }
 0x1b0   :  { %v513_v2 = vpop.f32.mrf.mxu1 }
 0x1b1   :  { %v514_v12 = vadd.f32 %v513_v2, %v380_v61 }
 0x1b2   :  { %v529_v5 = vpop.f32.mrf.mxu2 }
 0x1b3   :  { %v530_v7 = vadd.f32 %v529_v5, %v512_v1 }
 0x1b5   :  { %v539_v9 = vmul.f32 %v538_v6, %v530_v7 }
 0x1b7   :  { %v543_v10 = vadd.f32 %v542_v8, %v539_v9 }
 0x1b8   :  { %v516_v11 = vpop.f32.mrf.mxu1 }
 0x1b9   :  { %v546_v13 = vmax.f32 %v543_v10, 0.0  ;;  %v517_v19 = vadd.f32 %v516_v11, %v380_v61 }
 0x1ba   :  { %v531_v14 = vpop.f32.mrf.mxu2 }
 0x1bb   :  { %v532_v15 = vadd.f32 %v531_v14, %v514_v12  ;;  %1243 = vmatmul.msk.f32.vlgmr.msra.gmra.mxu3 %vm626_vm13, %v546_v13  ;;  %v1317_v12 = vld [vmem:[%s1814_s17 + $0x8] sm:$0xff]  ;;  %v1316_v14 = vld [vmem:[%s1814_s17] sm:$0xff] }
 0x1bc   :  { %796 = vmatpush.bf16.msra.mxu3 %v1634_v31  ;;  %885 = vmatpush.bf16.msrb.mxu2 %v1317_v12 }
 0x1bd   :  { %v540_v3 = vmul.f32 %v538_v6, %v532_v15 }
 0x1bf   :  { %v544_v16 = vadd.f32 %v542_v8, %v540_v3  ;;  %v1329_v3 = vld [vmem:[%s1815_s18] ss:$0 sm:$0xff] }
 0x1c0   :  { %v518_v18 = vpop.f32.mrf.mxu1  ;;  %886 = vmatpush.bf16.msrb.mxu2 %v1316_v14  ;;  %913 = vrot.lane.b32.xlu1 %v1329_v3, %s1384_s29 }
 0x1c1   :  { %v547_v20 = vmax.f32 %v544_v16, 0.0 }
 0x1c2   :  { %v534_v21 = vpop.f32.mrf.mxu2 }
 0x1c3   :  { %v535_v22 = vadd.f32 %v534_v21, %v517_v19  ;;  %1244 = vmatmul.msk.f32.gmra.mxu3 %vm626_vm13, %v547_v20 }
 0x1c5   :  { %v541_v23 = vmul.f32 %v538_v6, %v535_v22 }
 0x1c7   :  { %v545_v24 = vadd.f32 %v542_v8, %v541_v23  ;;  %v755_v23 = vld [vmem:[%s1808_s11] sm:$0x1] }
 0x1c9   :  { %v548_v25 = vmax.f32 %v545_v24, 0.0 }
 0x1ca   :  { %v536_v26 = vpop.f32.mrf.mxu2 }
 0x1cb   :  { %1245 = vmatmul.msk.f32.gmra.mxu3 %vm626_vm13, %v548_v25 }
 0x23e   :  { %v649_v35 = vpop.f32.mrf.mxu3 }
 0x23f   :  { %v1706_v38 = vadd.f32 %v649_v35, %v584_v36 }
 0x241   :  { %v676_v42 = vmul.f32 %v664_v34, %v1706_v38  ;;  %v826_v34 = vpack.c.b16 %v824_v33, %v824_v33 }
 0x243   :  { %v691_v46 = vmul.f32 %v676_v42, %v1706_v38  ;;  %v680_v50 = vsel %vm679_vm14, %v676_v42, 0.0  ;;  %v838_v35 = vsel %vm149_vm0, %v826_v34, 0 }
 0x244   :  { %846 = vmatpush.bf16.msrb.mxu1 %v838_v35 }
 0x245   :  { %v694_v52 = vsel %vm679_vm14, %v691_v46, 0.0 }
 0x246   :  { %v652_v37 = vpop.f32.mrf.mxu3 }
 0x247   :  { %v1708_v39 = vadd.f32 %v652_v37, %v584_v36 }
 0x249   :  { %v677_v41 = vmul.f32 %v669_v40, %v1708_v39 }
 0x24b   :  { %v692_v43 = vmul.f32 %v677_v41, %v1708_v39  ;;  %v681_v31 = vsel %vm679_vm14, %v677_v41, 0.0 }
 0x24c   :  { %v682_v51 = vadd.f32 %v681_v31, %v680_v50 }
 0x24d   :  { %v695_v48 = vsel %vm679_vm14, %v692_v43, 0.0 }
 0x24e   :  { %v655_v44 = vpop.f32.mrf.mxu3  ;;  %v696_v56 = vadd.f32 %v695_v48, %v694_v52 }
 0x24f   :  { %v1714_v47 = vadd.f32 %v655_v44, %v584_v36  ;;  %v1315_v36 = vld [vmem:[%s1812_s15] sm:$0xff]  ;;  %v1752_v44 = vpop.permute.xlu1 %913 }
 0x250   :  { %847 = vmatpush.bf16.msrb.mxu1 %v1315_v36 }
 0x251   :  { %v678_v49 = vmul.f32 %v674_v45, %v1714_v47 }
 0x253   :  { %v683_v53 = vsel %vm679_vm14, %v678_v49, 0.0  ;;  %v693_v54 = vmul.f32 %v678_v49, %v1714_v47 }
 0x254   :  { %v684_v55 = vadd.f32 %v683_v53, %v682_v51 }
 0x255   :  { %v697_v57 = vsel %vm679_vm14, %v693_v54, 0.0  ;;  %v1764_v54 = vld [vmem:[%s1813_s16] ss:$0 sm:$0xff]  ;;  %s1386_s16 = smov 96  }
 0x256   :  { %v685_v58 = vrot.slane %v684_v55, 4  ;;  %v698_v59 = vadd.f32 %v697_v57, %v696_v56 }
 0x258   :  { %v686_v60 = vadd.f32 %v685_v58, %v684_v55  ;;  %v699_v17 = vrot.slane %v698_v59, 4 }
 0x25a   :  { %v687_v61 = vrot.slane %v686_v60, 2  ;;  %v700_v62 = vadd.f32 %v699_v17, %v698_v59 }
 0x25c   :  { %v688_v63 = vadd.f32 %v687_v61, %v686_v60  ;;  %v701_v0 = vrot.slane %v700_v62, 2 }
 0x25e   :  { %v689_v1 = vrot.slane %v688_v63, 1  ;;  %v702_v2 = vadd.f32 %v701_v0, %v700_v62 }
 0x260   :  { %v690_v4 = vadd.f32 %v689_v1, %v688_v63  ;;  %v703_v5 = vrot.slane %v702_v2, 1 }
 0x262   :  { %v704_v6 = vadd.f32 %v703_v5, %v702_v2  ;;  %1250 = vmatmul.msk.f32.vlgmr.msrb.gmra.mxu3 %vm679_vm14, %v690_v4 }
 0x263   :  { %947 = vmatpush.bf16.msrb.mxu3 %v1317_v12 }
 0x264   :  { %1251 = vmatmul.msk.f32.vlgmr.msra.gmra.mxu1 %vm679_vm14, %v704_v6 }
 0x267   :  { %948 = vmatpush.bf16.msrb.mxu3 %v1316_v14 }
 0x2e1   :  { %v747_v7 = vpop.f32.mrf.mxu1 }
 0x2e2   :  { %v751_v10 = vmul.f32 0.055555556, %v747_v7 }
 0x2e5   :  { %v732_v8 = vpop.f32.mrf.mxu3 }
 0x2e6   :  { %v750_v9 = vmul.f32 0.055555556, %v732_v8 }
 0x2e8   :  { %v752_v11 = vmul.f32 %v750_v9, %v750_v9 }
 0x2ea   :  { %v753_v13 = vsub.f32 %v751_v10, %v752_v11 }
 0x2ec   :  { %v754_v15 = vmax.f32 %v753_v13, 0.0 }
 0x2ee   :  { %v756_v16 = vadd.f32 1e-05, %v754_v15 }
 0x2f0   :  { %1334 = vrsqrt.f32 %v756_v16  ;;  %vm763_vm1 = vweird.f32 %v756_v16 }
 0x2f6   :  { %v1335_v18 = vpop.eup %1334 }
 0x2f7   :  { %v758_v19 = vmul.f32 %v1335_v18, %v756_v16  ;;  %vm764_vm15 = vweird.f32 %v1335_v18 }
 0x2f8   :  { %vm765_vm2 = vmor %vm763_vm1, %vm764_vm15  ;;  %vm1088_vm15 = vcmask 254976  }
 0x2f9   :  { %v759_v20 = vmul.f32 %v1335_v18, %v758_v19 }
 0x2fb   :  { %v760_v21 = vmul.f32 0.5, %v759_v20 }
 0x2fd   :  { %v761_v22 = vsub.f32 1.5, %v760_v21 }
 0x2ff   :  { %v762_v24 = vmul.f32 %v1335_v18, %v761_v22 }
 0x301   :  { %v766_v25 = vsel %vm765_vm2, %v1335_v18, %v762_v24 }
 0x302   :  { %v767_v26 = vmul.f32 %v766_v25, %v755_v23 }
 0x304   :  { %v769_v28 = vmul.f32 %v767_v26, %v750_v9  ;;  %1252 = vmatmul.msk.f32.vlgmr.msra.gmra.mxu2 %vm551_vm12, %v767_v26 }
 0x305   :  { %1004 = vmatpush.bf16.msra.mxu2 %v1317_v12 }
 0x306   :  { %v770_v29 = vsub.f32 %v768_v27, %v769_v28 }
 0x308   :  { %1253 = vmatmul.msk.f32.vlgmr.msra.gmra.mxu3 %vm551_vm12, %v770_v29 }
 0x309   :  { %1005 = vmatpush.bf16.msra.mxu2 %v1316_v14 }
 0x30c   :  { %887 = vmatmul.f32.vlgmr.msrb.gmra.mxu2 %v1385_v30 }
 0x387   :  { %v783_v37 = vpop.f32.mrf.mxu2 }
 0x388   :  { %v801_v40 = vperm.slane %v783_v37, 0 }
 0x38a   :  { %v802_v42 = vmul.f32 %v801_v40, %v1706_v38  ;;  %v803_v49 = vmul.f32 %v801_v40, %v1708_v39  ;;  %v804_v52 = vmul.f32 %v801_v40, %v1714_v47 }
 0x38b   :  { %v798_v41 = vpop.f32.mrf.mxu3 }
 0x38c   :  { %v805_v43 = vperm.slane %v798_v41, 0 }
 0x38e   :  { %v806_v45 = vadd.f32 %v805_v43, %v802_v42  ;;  %v807_v50 = vadd.f32 %v805_v43, %v803_v49  ;;  %v808_v38 = vadd.f32 %v805_v43, %v804_v52 }
 0x38f   :  { %v888_v46 = vpop.f32.mrf.mxu2 }
 0x390   :  { %v809_v31 = vmax.f32 %v806_v45, 0.0  ;;  %v916_v48 = vadd.f32 %v1752_v44, %v888_v46  ;;  %v810_v51 = vmax.f32 %v807_v50, 0.0  ;;  %v811_v53 = vmax.f32 %v808_v38, 0.0 }
 0x392   :  { %1258 = vmatmul.msk.f32.vlgmr.msrb.gmra.mxu1 %vm679_vm14, %v809_v31  ;;  %918 = vrot.lane.b32.xlu2 %v916_v48, %s1384_s29 }
 0x39a   :  { %1259 = vmatmul.msk.f32.gmra.mxu1 %vm679_vm14, %v810_v51 }
 0x3a2   :  { %1260 = vmatmul.msk.f32.gmra.mxu1 %vm679_vm14, %v811_v53 }
 0x3ec   :  { %v919_v1 = vpop.permute.xlu2 %918 }
 0x40f   :  { %v849_v39 = vpop.f32.mrf.mxu1 }
 0x410   :  { %v850_v55 = vadd.f32 %v1764_v54, %v849_v39 }
 0x412   :  { %v891_v56 = vadd.f32 %v888_v46, %v850_v55 }
 0x414   :  { %v1269_v57 = vmul.f32 -1.442695, %v891_v56 }
 0x416   :  { %1336 = vpow2.f32 %v1269_v57 }
 0x417   :  { %v852_v18 = vpop.f32.mrf.mxu1 }
 0x418   :  { %v853_v19 = vadd.f32 %v1764_v54, %v852_v18 }
 0x41c   :  { %v1337_v58 = vpop.eup %1336 }
 0x41d   :  { %v895_v59 = vadd.f32 1.0, %v1337_v58 }
 0x41f   :  { %1338 = vrcp.f32 %v895_v59  ;;  %v907_v61 = vand.u32 2147483648, %v895_v59  ;;  %v905_v63 = vand.u32 2147483647, %v895_v59  ;;  %vm901_vm3 = vweird.f32 %v895_v59  ;;  %v855_v51 = vpop.f32.mrf.mxu1 }
 0x420   :  { %v856_v52 = vadd.f32 %v1764_v54, %v855_v51 }
 0x421   :  { %v908_v2 = vor.u32 1.1754944e-38, %v907_v61  ;;  %vm906_vm5 = vcmp.eq.f32.partialorder %v905_v63, 8.507059e+37 }
 0x425   :  { %v1339_v47 = vpop.eup %1338 }
 0x426   :  { %v897_v60 = vmul.f32 %v1339_v47, %v895_v59  ;;  %vm902_vm0 = vweird.f32 %v1339_v47 }
 0x427   :  { %vm903_vm4 = vmor %vm901_vm3, %vm902_vm0 }
 0x428   :  { %v898_v17 = vsub.f32 1.0, %v897_v60 }
 0x42a   :  { %v899_v62 = vmul.f32 %v1339_v47, %v898_v17 }
 0x42c   :  { %v900_v0 = vadd.f32 %v1339_v47, %v899_v62 }
 0x42e   :  { %v904_v4 = vsel %vm903_vm4, %v1339_v47, %v900_v0 }
 0x42f   :  { %v909_v5 = vsel %vm906_vm5, %v908_v2, %v904_v4  ;;  %v1319_v4 = vld [vmem:[%s1816_s19 + $0x8] sm:$0xff] }
 0x430   :  { %v921_v6 = vmul.f32 %v919_v1, %v909_v5  ;;  %v928_v10 = vsub.f32 1.0, %v909_v5  ;;  %v934_v12 = vmul.f32 0.0, %v909_v5  ;;  %1081 = vmatpush.bf16.msra.mxu3 %v1319_v4  ;;  %v1318_v5 = vld [vmem:[%s1816_s19] sm:$0xff]  ;;  %s1095_s19 = sshll.u32 %s1387_s24, 4  ;;  %s1096_s19 = int_to_ptr.vmem [resolvable:$true] %s1095_s19 }
 0x432   :  { %923 = vrot.lane.b32.xlu2 %v921_v6, %s1384_s29 }
 0x434   :  { %1082 = vmatpush.bf16.msra.mxu3 %v1318_v5 }
 0x48c   :  { %v924_v7 = vpop.permute.xlu2 %923 }
 0x48d   :  { %v926_v8 = vadd.f32 %v924_v7, %v850_v55 }
 0x48f   :  { %1340 = vtanh.f32 %v926_v8 }
 0x495   :  { %v1341_v9 = vpop.eup %1340 }
 0x496   :  { %930 = vrot.lane.b32.xlu0 %v1341_v9, %s1386_s16 }
 0x508   :  { %v931_v11 = vpop.permute.xlu0 %930 }
 0x509   :  { %v933_v13 = vmul.f32 %v931_v11, %v928_v10 }
 0x50b   :  { %v935_v14 = vadd.f32 %v934_v12, %v933_v13  ;;  %v1331_v12 = vld [vmem:[%s1817_s20] ss:$0 sm:$0xff] }
 0x50d   :  { %937 = vrot.lane.b32.xlu1 %v935_v14, %s1386_s16 }
 0x57f   :  { %v938_v15 = vpop.permute.xlu1 %937 }
 0x580   :  { %1270 = vmatmul.msk.f32.vlgmr.msrb.gmra.mxu3 %vm875_vm6, %v938_v15 }
 0x603   :  { %v950_v3 = vpop.f32.mrf.mxu3 }
 0x604   :  { %v973_v16 = vadd.f32 %v950_v3, %v1752_v44  ;;  %v953_v20 = vadd.f32 %v950_v3, %v853_v19 }
 0x606   :  { %975 = vrot.lane.b32.xlu2 %v973_v16, %s1384_s29  ;;  %v1271_v21 = vmul.f32 -1.442695, %v953_v20 }
 0x608   :  { %1342 = vpow2.f32 %v1271_v21 }
 0x60e   :  { %v1343_v22 = vpop.eup %1342 }
 0x60f   :  { %v957_v23 = vadd.f32 1.0, %v1343_v22 }
 0x611   :  { %1344 = vrcp.f32 %v957_v23  ;;  %v969_v29 = vand.u32 2147483648, %v957_v23  ;;  %vm963_vm8 = vweird.f32 %v957_v23  ;;  %v967_v30 = vand.u32 2147483647, %v957_v23 }
 0x613   :  { %v970_v33 = vor.u32 1.1754944e-38, %v969_v29  ;;  %vm968_vm10 = vcmp.eq.f32.partialorder %v967_v30, 8.507059e+37 }
 0x617   :  { %v1345_v24 = vpop.eup %1344 }
 0x618   :  { %v959_v25 = vmul.f32 %v1345_v24, %v957_v23  ;;  %vm964_vm7 = vweird.f32 %v1345_v24 }
 0x619   :  { %vm965_vm9 = vmor %vm963_vm8, %vm964_vm7 }
 0x61a   :  { %v960_v26 = vsub.f32 1.0, %v959_v25 }
 0x61c   :  { %v961_v27 = vmul.f32 %v1345_v24, %v960_v26 }
 0x61e   :  { %v962_v28 = vadd.f32 %v1345_v24, %v961_v27 }
 0x620   :  { %v966_v32 = vsel %vm965_vm9, %v1345_v24, %v962_v28 }
 0x621   :  { %v971_v35 = vsel %vm968_vm10, %v970_v33, %v966_v32 }
 0x622   :  { %v985_v42 = vsub.f32 1.0, %v971_v35  ;;  %v991_v45 = vmul.f32 %v971_v35, %v935_v14 }
 0x660   :  { %v976_v34 = vpop.permute.xlu2 %975 }
 0x661   :  { %v978_v36 = vmul.f32 %v976_v34, %v971_v35 }
 0x663   :  { %980 = vrot.lane.b32.xlu0 %v978_v36, %s1384_s29 }
 0x6d5   :  { %v981_v37 = vpop.permute.xlu0 %980 }
 0x6d6   :  { %v983_v40 = vadd.f32 %v981_v37, %v853_v19 }
 0x6d8   :  { %1346 = vtanh.f32 %v983_v40 }
 0x6de   :  { %v1347_v41 = vpop.eup %1346 }
 0x6df   :  { %987 = vrot.lane.b32.xlu1 %v1347_v41, %s1386_s16 }
 0x751   :  { %v988_v43 = vpop.permute.xlu1 %987 }
 0x752   :  { %v990_v46 = vmul.f32 %v988_v43, %v985_v42 }
 0x754   :  { %v992_v31 = vadd.f32 %v991_v45, %v990_v46 }
 0x756   :  { %994 = vrot.lane.b32.xlu2 %v992_v31, %s1386_s16 }
 0x7b0   :  { %v995_v48 = vpop.permute.xlu2 %994 }
 0x7b1   :  { %1272 = vmatmul.msk.f32.vlgmr.msra.gmra.mxu2 %vm875_vm6, %v995_v48 }
 0x834   :  { %v1007_v49 = vpop.f32.mrf.mxu2 }
 0x835   :  { %v1030_v50 = vadd.f32 %v1007_v49, %v1752_v44  ;;  %v1010_v38 = vadd.f32 %v1007_v49, %v856_v52 }
 0x837   :  { %1032 = vrot.lane.b32.xlu0 %v1030_v50, %s1384_s29  ;;  %v1273_v53 = vmul.f32 -1.442695, %v1010_v38 }
 0x839   :  { %1348 = vpow2.f32 %v1273_v53 }
 0x83f   :  { %v1349_v39 = vpop.eup %1348 }
 0x840   :  { %v1014_v55 = vadd.f32 1.0, %v1349_v39 }
 0x842   :  { %1350 = vrcp.f32 %v1014_v55  ;;  %v1026_v60 = vand.u32 2147483648, %v1014_v55  ;;  %vm1020_vm12 = vweird.f32 %v1014_v55  ;;  %v1024_v44 = vand.u32 2147483647, %v1014_v55 }
 0x844   :  { %v1027_v61 = vor.u32 1.1754944e-38, %v1026_v60  ;;  %vm1025_vm14 = vcmp.eq.f32.partialorder %v1024_v44, 8.507059e+37 }
 0x848   :  { %v1351_v56 = vpop.eup %1350 }
 0x849   :  { %v1016_v57 = vmul.f32 %v1351_v56, %v1014_v55  ;;  %vm1021_vm11 = vweird.f32 %v1351_v56 }
 0x84a   :  { %vm1022_vm13 = vmor %vm1020_vm12, %vm1021_vm11 }
 0x84b   :  { %v1017_v58 = vsub.f32 1.0, %v1016_v57 }
 0x84d   :  { %v1018_v59 = vmul.f32 %v1351_v56, %v1017_v58 }
 0x84f   :  { %v1019_v47 = vadd.f32 %v1351_v56, %v1018_v59 }
 0x851   :  { %v1023_v17 = vsel %vm1022_vm13, %v1351_v56, %v1019_v47 }
 0x852   :  { %v1028_v62 = vsel %vm1025_vm14, %v1027_v61, %v1023_v17 }
 0x853   :  { %v1042_v6 = vsub.f32 1.0, %v1028_v62  ;;  %v1048_v8 = vmul.f32 %v1028_v62, %v992_v31 }
 0x8a9   :  { %v1033_v54 = vpop.permute.xlu0 %1032 }
 0x8aa   :  { %v1035_v63 = vmul.f32 %v1033_v54, %v1028_v62 }
 0x8ac   :  { %1037 = vrot.lane.b32.xlu1 %v1035_v63, %s1384_s29 }
 0x91e   :  { %v1038_v0 = vpop.permute.xlu1 %1037 }
 0x91f   :  { %v1040_v1 = vadd.f32 %v1038_v0, %v856_v52 }
 0x921   :  { %1352 = vtanh.f32 %v1040_v1 }
 0x927   :  { %v1353_v2 = vpop.eup %1352 }
 0x928   :  { %1044 = vrot.lane.b32.xlu2 %v1353_v2, %s1386_s16 }
 0x982   :  { %v1045_v7 = vpop.permute.xlu2 %1044 }
 0x983   :  { %v1047_v9 = vmul.f32 %v1045_v7, %v1042_v6 }
 0x985   :  { %v1049_v10 = vadd.f32 %v1048_v8, %v1047_v9 }
 0x987   :  { %1059 = vrot.lane.b32.xlu0 %v1049_v10, %s1386_s16 }
 0x9f9   :  { %v1060_v11 = vpop.permute.xlu0 %1059 }
 0x9fa   :  { %1282 = vmatmul.msk.f32.vlgmr.msra.gmra.mxu3 %vm875_vm6, %v1060_v11 }
 0xa7d   :  { %v1084_v13 = vpop.f32.mrf.mxu3 }
 0xa7e   :  { %v1085_v14 = vadd.f32 %v1331_v12, %v1084_v13 }
 0xa80   :  { %1354 = vtanh.f32 %v1085_v14 }
 0xa86   :  { %v1355_v15 = vpop.eup %1354 }
 0xa87   :  { %1089 = vst.msk [vmem:[#allocation2] sm:$0x3] %vm1088_vm15, %v1355_v15 }
 0xa88   :  { %1100 = dma.vmem_to_hbm [thread:$0]  %s1096_s19, 32, %s1098_s25, [#allocation3]  }
 0xa89   :  { %1380 = dma.done.wait [#allocation3], 32  }
 0xa8a   :  { %1381 = vsyncadd [#allocation3], 4294967264 }
 0xa8b   :  { %1105 = vsyncpa [#allocation3], 1 }

</bundles_post_ra>
